<compile_context>
chip_gen: v7x
topology: tpu7x:2x2x1
jax: 0.10.0
libtpu: 0.0.40
codegen_flags: <defaults>
</compile_context>

<pallas_src>
import functools

import jax
import jax.numpy as jnp
from jax.experimental import pallas as pl
from jax.experimental.pallas import tpu as pltpu


# ---------------------------------------------------------------------------
# Pallas kernels: (patches @ W_scaled) + bias [+ residual | + shortcut matmul], ReLU
# (BN scale already folded into the bf16 weights; f32 accumulate on the MXU.)
# ---------------------------------------------------------------------------
def _conv_bn_relu_kernel(p_ref, w_ref, b_ref, o_ref):
    acc = jnp.dot(p_ref[...], w_ref[...], preferred_element_type=jnp.float32)
    o_ref[...] = jnp.maximum(acc + b_ref[...], 0.0).astype(o_ref.dtype)


def _conv_bn_add_relu_kernel(p_ref, w_ref, b_ref, r_ref, o_ref):
    # identity shortcut: out = relu( patches @ Ws + b + residual )   (VPU add)
    acc = jnp.dot(p_ref[...], w_ref[...], preferred_element_type=jnp.float32)
    out = acc + b_ref[...] + r_ref[...].astype(jnp.float32)
    o_ref[...] = jnp.maximum(out, 0.0).astype(o_ref.dtype)


def _conv_bn_shortcut_relu_kernel(p_ref, w_ref, xs_ref, ws_ref, b_ref, o_ref):
    # projection shortcut: out = relu( patches @ W2s + xs @ Wss + (b2 + bs) )
    main = jnp.dot(p_ref[...], w_ref[...], preferred_element_type=jnp.float32)
    sc = jnp.dot(xs_ref[...], ws_ref[...], preferred_element_type=jnp.float32)
    o_ref[...] = jnp.maximum(main + sc + b_ref[...], 0.0).astype(o_ref.dtype)


# ---------------------------------------------------------------------------
# Generation-aware tiling configuration
# ---------------------------------------------------------------------------
def _round_up(x, m):
    return (x + m - 1) // m * m


@functools.lru_cache(maxsize=None)
def _chip_config():
    """Pick lane tile, row tile, VMEM budget and LHS buffering per TPU generation."""
    try:
        kind = jax.devices()[0].device_kind.lower()
    except Exception:
        kind = ""
    if "v5" in kind:
        gen = 5
    elif "v6" in kind:
        gen = 6
    elif "v7" in kind or "7x" in kind:
        gen = 7
    else:
        gen = 6
    if gen <= 5:
        # 128-wide MXU, 128 MiB physical VMEM, single vst slot -> tn=128, deep LHS buffering.
        return dict(gen=gen, tn_pref=128, tm_target=1024,
                    vmem=96 * 1024 * 1024, lhs_buffers=3)
    if gen == 6:
        # 256-wide MXU, 128 MiB physical VMEM.
        return dict(gen=gen, tn_pref=256, tm_target=1024,
                    vmem=96 * 1024 * 1024, lhs_buffers=2)
    # v7x: 64 MiB physical VMEM, 2 TensorCores per chip.
    return dict(gen=gen, tn_pref=256, tm_target=512,
                vmem=48 * 1024 * 1024, lhs_buffers=2)


def _lane_tile(cout, cfg):
    """Return (padded Cout, lane tile).  Cout that is already a multiple of 128 is
    never padded (no extra HBM pass / output slice for the big layers)."""
    cp = _round_up(cout, 128)
    tn = cfg["tn_pref"] if cp % cfg["tn_pref"] == 0 else 128
    return cp, tn


def _row_tile(m, lane_tiles, cfg):
    tm = min(cfg["tm_target"], m)
    if tm < m and tm % 8:
        tm = _round_up(tm, 8)
    gi = pl.cdiv(m, tm)
    # v7x shards the parallel grid axes over its 2 TensorCores: guarantee >=2 steps.
    if cfg["gen"] >= 7 and lane_tiles == 1 and gi == 1 and m > 8:
        tm = _round_up(pl.cdiv(m, 2), 8)
        gi = pl.cdiv(m, tm)
    return tm, gi


def _pad_cols(a, cols):
    if a.shape[1] == cols:
        return a
    return jnp.pad(a, ((0, 0), (0, cols - a.shape[1])))


def _streamed_spec(block_shape, cfg):
    """BlockSpec for the row-streamed LHS operands (varies on the inner grid axis);
    deeper buffering on v5e to hide HBM DMA latency."""
    idx = lambda j, i: (i, 0)
    if cfg["lhs_buffers"] > 2:
        try:
            return pl.BlockSpec(block_shape, idx,
                                pipeline_mode=pl.Buffered(cfg["lhs_buffers"]))
        except TypeError:  # older BlockSpec signature without pipeline_mode
            pass
    return pl.BlockSpec(block_shape, idx)


def _compiler_params(cfg):
    return pltpu.CompilerParams(
        dimension_semantics=("parallel", "parallel"),
        vmem_limit_bytes=cfg["vmem"])


# ---------------------------------------------------------------------------
# pallas_call wrappers
# grid = (Cout tiles [outer], row tiles [inner]) -> weight tile stays resident
# across the inner row loop; output / LHS tiles stream.
# ---------------------------------------------------------------------------
def conv_bn_relu(patches, w, bias, *, out_dtype=jnp.bfloat16):
    M, Kp = patches.shape
    Cout = w.shape[1]
    cfg = _chip_config()
    Cp, tn = _lane_tile(Cout, cfg)
    gj = Cp // tn
    tm, gi = _row_tile(M, gj, cfg)

    wb = _pad_cols(w, Cp).astype(jnp.bfloat16)
    bb = _pad_cols(bias.reshape(1, Cout).astype(jnp.float32), Cp)

    out = pl.pallas_call(
        _conv_bn_relu_kernel,
        out_shape=jax.ShapeDtypeStruct((M, Cp), out_dtype),
        grid=(gj, gi),
        in_specs=[
            _streamed_spec((tm, Kp), cfg),
            pl.BlockSpec((Kp, tn), lambda j, i: (0, j)),
            pl.BlockSpec((1, tn), lambda j, i: (0, j)),
        ],
        out_specs=pl.BlockSpec((tm, tn), lambda j, i: (i, j)),
        compiler_params=_compiler_params(cfg),
    )(patches.astype(jnp.bfloat16), wb, bb)
    return out if Cp == Cout else out[:, :Cout]


def conv_bn_add_relu(patches, w, bias, residual, *, out_dtype=jnp.bfloat16):
    M, Kp = patches.shape
    Cout = w.shape[1]
    cfg = _chip_config()
    Cp, tn = _lane_tile(Cout, cfg)
    gj = Cp // tn
    tm, gi = _row_tile(M, gj, cfg)

    wb = _pad_cols(w, Cp).astype(jnp.bfloat16)
    bb = _pad_cols(bias.reshape(1, Cout).astype(jnp.float32), Cp)
    rb = _pad_cols(residual.astype(jnp.bfloat16), Cp)

    out = pl.pallas_call(
        _conv_bn_add_relu_kernel,
        out_shape=jax.ShapeDtypeStruct((M, Cp), out_dtype),
        grid=(gj, gi),
        in_specs=[
            _streamed_spec((tm, Kp), cfg),
            pl.BlockSpec((Kp, tn), lambda j, i: (0, j)),
            pl.BlockSpec((1, tn), lambda j, i: (0, j)),
            pl.BlockSpec((tm, tn), lambda j, i: (i, j)),
        ],
        out_specs=pl.BlockSpec((tm, tn), lambda j, i: (i, j)),
        compiler_params=_compiler_params(cfg),
    )(patches.astype(jnp.bfloat16), wb, bb, rb)
    return out if Cp == Cout else out[:, :Cout]


def conv_bn_shortcut_relu(patches, w, xs, ws, bias, *, out_dtype=jnp.bfloat16):
    M, Kp = patches.shape
    Cout = w.shape[1]
    Ksp = xs.shape[1]
    cfg = _chip_config()
    Cp, tn = _lane_tile(Cout, cfg)
    gj = Cp // tn
    tm, gi = _row_tile(M, gj, cfg)

    wb = _pad_cols(w, Cp).astype(jnp.bfloat16)
    wsb = _pad_cols(ws, Cp).astype(jnp.bfloat16)
    bb = _pad_cols(bias.reshape(1, Cout).astype(jnp.float32), Cp)

    out = pl.pallas_call(
        _conv_bn_shortcut_relu_kernel,
        out_shape=jax.ShapeDtypeStruct((M, Cp), out_dtype),
        grid=(gj, gi),
        in_specs=[
            _streamed_spec((tm, Kp), cfg),
            pl.BlockSpec((Kp, tn), lambda j, i: (0, j)),
            _streamed_spec((tm, Ksp), cfg),
            pl.BlockSpec((Ksp, tn), lambda j, i: (0, j)),
            pl.BlockSpec((1, tn), lambda j, i: (0, j)),
        ],
        out_specs=pl.BlockSpec((tm, tn), lambda j, i: (i, j)),
        compiler_params=_compiler_params(cfg),
    )(patches.astype(jnp.bfloat16), wb, xs.astype(jnp.bfloat16), wsb, bb)
    return out if Cp == Cout else out[:, :Cout]


# ---------------------------------------------------------------------------
# Glue: im2col (with fused lane-aligned K pad), weight reshaping, BN folding
# ---------------------------------------------------------------------------
def im2col_nhwc(x, k, stride, pad, lane_align=128):
    """x: (N,H,W,C) -> (N*Ho*Wo, Kp).  K = k*k*C, index (dh*k+dw)*C + c; the zero-pad
    of K up to a multiple of `lane_align` is fused into the single materialization."""
    N, H, W, C = x.shape
    xp = jnp.pad(x, ((0, 0), (pad, pad), (pad, pad), (0, 0)))
    Ho = (H + 2 * pad - k) // stride + 1
    Wo = (W + 2 * pad - k) // stride + 1
    cols = []
    for dh in range(k):
        for dw in range(k):
            cols.append(xp[:, dh:dh + stride * Ho:stride, dw:dw + stride * Wo:stride, :])
    K = k * k * C
    Kp = _round_up(K, lane_align)
    if Kp > K:
        cols.append(jnp.zeros((N, Ho, Wo, Kp - K), x.dtype))
    patches = jnp.concatenate(cols, axis=-1)
    return patches.reshape(N * Ho * Wo, Kp), (N, Ho, Wo)


def conv_weight_to_mat(w_pt, scale, lane_align=128):
    """PyTorch conv weight (Cout,Cin,kh,kw) -> bf16 (Kp, Cout) matching im2col order,
    with the eval-mode BN scale folded in and K rows zero-padded to the same Kp."""
    Cout, Cin, kh, kw = w_pt.shape
    w = jnp.transpose(w_pt, (2, 3, 1, 0)).reshape(kh * kw * Cin, Cout)
    w = w.astype(jnp.float32) * scale.reshape(1, Cout)
    K = kh * kw * Cin
    Kp = _round_up(K, lane_align)
    if Kp > K:
        w = jnp.pad(w, ((0, Kp - K), (0, 0)))
    return w.astype(jnp.bfloat16)


def bn_fold(gamma, beta, mean, var, eps=1e-5):
    scale = gamma / jnp.sqrt(var + eps)
    bias = beta - mean * scale
    c = scale.shape[0]
    return scale.reshape(1, c), bias.reshape(1, c)


def block_forward_nhwc(x_nhwc, params, *, stride, out_dtype=jnp.bfloat16):
    """Equivalent of Block.forward (eval-mode BN).  NHWC in / NHWC out.  The conv1
    intermediate and (by default) the block output are bf16; pass out_dtype=f32 only
    for the final model output."""
    N, H, W, Cin = x_nhwc.shape
    planes = params["w1"].shape[0]
    x = x_nhwc.astype(jnp.bfloat16)

    # conv1 (3x3, stride, pad=1) + bn1 + relu  (bf16 intermediate)
    p1, (n, Ho, Wo) = im2col_nhwc(x, 3, stride, 1)
    w1 = conv_weight_to_mat(params["w1"], params["s1"])
    out1 = conv_bn_relu(p1, w1, params["b1"], out_dtype=jnp.bfloat16)
    out1_nhwc = out1.reshape(n, Ho, Wo, planes)

    # conv2 (3x3, stride 1, pad=1) + bn2, fused with shortcut + relu
    p2, _ = im2col_nhwc(out1_nhwc, 3, 1, 1)
    w2 = conv_weight_to_mat(params["w2"], params["s2"])

    if stride != 1 or Cin != planes:
        # projection shortcut: 1x1 conv (stride) + BN, fused into the same kernel
        xs = x[:, ::stride, ::stride, :].reshape(n * Ho * Wo, Cin)
        Ksp = _round_up(Cin, 128)
        if Ksp > Cin:
            xs = jnp.pad(xs, ((0, 0), (0, Ksp - Cin)))
        ws = conv_weight_to_mat(params["ws"], params["ss"])
        bias = params["b2"] + params["bs"]            # merged BN biases
        out = conv_bn_shortcut_relu(p2, w2, xs, ws, bias, out_dtype=out_dtype)
    else:
        # identity shortcut: plain residual add on the VPU (no x @ I matmul)
        res = x.reshape(n * Ho * Wo, Cin)
        out = conv_bn_add_relu(p2, w2, params["b2"], res, out_dtype=out_dtype)

    return out.reshape(n, Ho, Wo, planes)


# ---------------------------------------------------------------------------
# Pure-JAX f32 reference (for correctness check)
# ---------------------------------------------------------------------------
def _conv_ref(x, w_pt, stride, pad):
    w = jnp.transpose(w_pt, (2, 3, 1, 0))  # HWIO
    return jax.lax.conv_general_dilated(
        x, w, window_strides=(stride, stride),
        padding=((pad, pad), (pad, pad)),
        dimension_numbers=("NHWC", "HWIO", "NHWC"))


def block_reference_nhwc(x_nhwc, params, stride):
    x = x_nhwc.astype(jnp.float32)
    Cin = x.shape[-1]
    planes = params["w1"].shape[0]
    o = jnp.maximum(_conv_ref(x, params["w1"], stride, 1) * params["s1"] + params["b1"], 0.0)
    o = _conv_ref(o, params["w2"], 1, 1) * params["s2"] + params["b2"]
    if stride != 1 or Cin != planes:
        sc = _conv_ref(x, params["ws"], stride, 0) * params["ss"] + params["bs"]
    else:
        sc = x
    return jnp.maximum(o + sc, 0.0)


# ---------------------------------------------------------------------------
# Deterministic parameter init + run
# ---------------------------------------------------------------------------
def make_bn_params(key, c, eps=1e-5):
    kg, kb, km, kv = jax.random.split(key, 4)
    gamma = 1.0 + 0.1 * jax.random.normal(kg, (c,), jnp.float32)
    beta = 0.1 * jax.random.normal(kb, (c,), jnp.float32)
    mean = 0.1 * jax.random.normal(km, (c,), jnp.float32)
    var = jnp.abs(jax.random.normal(kv, (c,), jnp.float32)) + 0.5
    return bn_fold(gamma, beta, mean, var, eps)


if __name__ == "__main__":
    key = jax.random.PRNGKey(0)
    N, Cin, H, W = 2, 4, 16, 16
    planes = 8
    stride = 1

    ks = jax.random.split(key, 12)
    x_nchw = jax.random.normal(ks[0], (N, Cin, H, W), jnp.float32)

    # Block 1: in_planes != planes -> projection (1x1 conv + BN) shortcut path
    s1, b1 = make_bn_params(ks[4], planes)
    s2, b2 = make_bn_params(ks[5], planes)
    ss, bs = make_bn_params(ks[6], planes)
    params1 = dict(
        w1=0.1 * jax.random.normal(ks[1], (planes, Cin, 3, 3), jnp.float32),
        w2=0.1 * jax.random.normal(ks[2], (planes, planes, 3, 3), jnp.float32),
        ws=0.1 * jax.random.normal(ks[3], (planes, Cin, 1, 1), jnp.float32),
        s1=s1, b1=b1, s2=s2, b2=b2, ss=ss, bs=bs,
    )

    # Block 2: in_planes == planes, stride=1 -> identity shortcut (VPU add kernel)
    s1b, b1b = make_bn_params(ks[9], planes)
    s2b, b2b = make_bn_params(ks[10], planes)
    params2 = dict(
        w1=0.1 * jax.random.normal(ks[7], (planes, planes, 3, 3), jnp.float32),
        w2=0.1 * jax.random.normal(ks[8], (planes, planes, 3, 3), jnp.float32),
        s1=s1b, b1=b1b, s2=s2b, b2=b2b,
    )

    block_fn = jax.jit(block_forward_nhwc, static_argnames=("stride", "out_dtype"))

    # One NCHW->NHWC transpose at model entry; blocks stay NHWC (bf16) in between.
    x_nhwc = jnp.transpose(x_nchw, (0, 2, 3, 1))
    o1 = block_fn(x_nhwc, params1, stride=stride)                       # bf16 out
    o2 = block_fn(o1, params2, stride=1, out_dtype=jnp.float32)         # final f32
    out_nchw = jnp.transpose(o2, (0, 3, 1, 2))
    jax.block_until_ready(out_nchw)

    # Pure-JAX f32 reference
    r1 = block_reference_nhwc(x_nhwc, params1, stride)
    r2 = block_reference_nhwc(r1, params2, 1)
    ref_nchw = jnp.transpose(r2, (0, 3, 1, 2))

    assert out_nchw.shape == (N, planes, H // stride, W // stride)
    assert bool(jnp.all(out_nchw >= 0.0))          # ReLU output is non-negative
    assert bool(jnp.all(jnp.isfinite(out_nchw)))
    # bf16 activations / weights / block-1 output -> loose abs tolerance vs f32 ref
    err = float(jnp.max(jnp.abs(out_nchw - ref_nchw)))
    assert err < 0.2, f"max abs error vs f32 reference too large: {err}"
    print("KERNEL_OK")
</pallas_src>

<mosaic_0001>
module attributes {stable_mosaic.version = 11 : i64} {
  func.func @_conv_bn_relu_kernel(%arg0: i32, %arg1: i32, %arg2: memref<512x128xbf16, #tpu.memory_space<vmem>>, %arg3: memref<128x128xbf16, #tpu.memory_space<vmem>>, %arg4: memref<1x128xf32, #tpu.memory_space<vmem>>, %arg5: memref<512x128xbf16, #tpu.memory_space<vmem>>) attributes {dimension_semantics = [#tpu.dimension_semantics<parallel>, #tpu.dimension_semantics<parallel>], iteration_bounds = array<i64: 1, 1>, scalar_prefetch = 0 : i64, scratch_operands = 0 : i64, tpu.core_type = #tpu.core_type<tc>, window_params = [{transform_indices = @transform_0, window_bounds = array<i64: 512, 128>}, {transform_indices = @transform_1, window_bounds = array<i64: 128, 128>}, {transform_indices = @transform_2, window_bounds = array<i64: 1, 128>}, {transform_indices = @transform_3, window_bounds = array<i64: 512, 128>}]} {
    %c0 = arith.constant 0 : index
    %c0_0 = arith.constant 0 : index
    %0 = vector.load %arg2[%c0, %c0_0] : memref<512x128xbf16, #tpu.memory_space<vmem>>, vector<512x128xbf16>
    %c0_1 = arith.constant 0 : index
    %c0_2 = arith.constant 0 : index
    %1 = vector.load %arg3[%c0_1, %c0_2] : memref<128x128xbf16, #tpu.memory_space<vmem>>, vector<128x128xbf16>
    %cst = arith.constant dense<0.000000e+00> : vector<512x128xf32>
    %2 = tpu.matmul %0, %1, %cst {dimension_numbers = #tpu.dot_dimension_numbers<[1], [0], [0], [1], [0, 0, 1, 1], [], []>} : vector<512x128xbf16>, vector<128x128xbf16>, vector<512x128xf32> -> vector<512x128xf32>
    %c0_3 = arith.constant 0 : index
    %c0_4 = arith.constant 0 : index
    %3 = vector.load %arg4[%c0_3, %c0_4] : memref<1x128xf32, #tpu.memory_space<vmem>>, vector<1x128xf32>
    %4 = vector.broadcast %3 : vector<1x128xf32> to vector<512x128xf32>
    %5 = arith.addf %2, %4 : vector<512x128xf32>
    %cst_5 = arith.constant 0.000000e+00 : f32
    %6 = vector.broadcast %cst_5 : f32 to vector<512x128xf32>
    %7 = arith.maximumf %5, %6 : vector<512x128xf32>
    %8 = arith.truncf %7 : vector<512x128xf32> to vector<512x128xbf16>
    %c0_6 = arith.constant 0 : index
    %c0_7 = arith.constant 0 : index
    %9 = vector.load %arg5[%c0_6, %c0_7] : memref<512x128xbf16, #tpu.memory_space<vmem>>, vector<512x128xbf16>
    tpu.vector_store %arg5[%c0_6, %c0_7], %8 {strides = array<i32>} : memref<512x128xbf16, #tpu.memory_space<vmem>>, vector<512x128xbf16>,
    return
  }
  func.func @transform_0(%arg0: i32, %arg1: i32) -> (i32, i32) {
    %c0_i32 = arith.constant 0 : i32
    %c0_i32_0 = arith.constant 0 : i32
    return %arg1, %c0_i32 : i32, i32
  }
  func.func @transform_1(%arg0: i32, %arg1: i32) -> (i32, i32) {
    %c0_i32 = arith.constant 0 : i32
    %c0_i32_0 = arith.constant 0 : i32
    return %c0_i32, %arg0 : i32, i32
  }
  func.func @transform_2(%arg0: i32, %arg1: i32) -> (i32, i32) {
    %c0_i32 = arith.constant 0 : i32
    %c0_i32_0 = arith.constant 0 : i32
    return %c0_i32, %arg0 : i32, i32
  }
  func.func @transform_3(%arg0: i32, %arg1: i32) -> (i32, i32) {
    %c0_i32 = arith.constant 0 : i32
    return %arg1, %arg0 : i32, i32
  }
}

module attributes {stable_mosaic.version = 11 : i64} {
  func.func @_conv_bn_shortcut_relu_kernel(%arg0: i32, %arg1: i32, %arg2: memref<512x128xbf16, #tpu.memory_space<vmem>>, %arg3: memref<128x128xbf16, #tpu.memory_space<vmem>>, %arg4: memref<512x128xbf16, #tpu.memory_space<vmem>>, %arg5: memref<128x128xbf16, #tpu.memory_space<vmem>>, %arg6: memref<1x128xf32, #tpu.memory_space<vmem>>, %arg7: memref<512x128xbf16, #tpu.memory_space<vmem>>) attributes {dimension_semantics = [#tpu.dimension_semantics<parallel>, #tpu.dimension_semantics<parallel>], iteration_bounds = array<i64: 1, 1>, scalar_prefetch = 0 : i64, scratch_operands = 0 : i64, tpu.core_type = #tpu.core_type<tc>, window_params = [{transform_indices = @transform_0, window_bounds = array<i64: 512, 128>}, {transform_indices = @transform_1, window_bounds = array<i64: 128, 128>}, {transform_indices = @transform_2, window_bounds = array<i64: 512, 128>}, {transform_indices = @transform_3, window_bounds = array<i64: 128, 128>}, {transform_indices = @transform_4, window_bounds = array<i64: 1, 128>}, {transform_indices = @transform_5, window_bounds = array<i64: 512, 128>}]} {
    %c0 = arith.constant 0 : index
    %c0_0 = arith.constant 0 : index
    %0 = vector.load %arg2[%c0, %c0_0] : memref<512x128xbf16, #tpu.memory_space<vmem>>, vector<512x128xbf16>
    %c0_1 = arith.constant 0 : index
    %c0_2 = arith.constant 0 : index
    %1 = vector.load %arg3[%c0_1, %c0_2] : memref<128x128xbf16, #tpu.memory_space<vmem>>, vector<128x128xbf16>
    %cst = arith.constant dense<0.000000e+00> : vector<512x128xf32>
    %2 = tpu.matmul %0, %1, %cst {dimension_numbers = #tpu.dot_dimension_numbers<[1], [0], [0], [1], [0, 0, 1, 1], [], []>} : vector<512x128xbf16>, vector<128x128xbf16>, vector<512x128xf32> -> vector<512x128xf32>
    %c0_3 = arith.constant 0 : index
    %c0_4 = arith.constant 0 : index
    %3 = vector.load %arg4[%c0_3, %c0_4] : memref<512x128xbf16, #tpu.memory_space<vmem>>, vector<512x128xbf16>
    %c0_5 = arith.constant 0 : index
    %c0_6 = arith.constant 0 : index
    %4 = vector.load %arg5[%c0_5, %c0_6] : memref<128x128xbf16, #tpu.memory_space<vmem>>, vector<128x128xbf16>
    %cst_7 = arith.constant dense<0.000000e+00> : vector<512x128xf32>
    %5 = tpu.matmul %3, %4, %cst_7 {dimension_numbers = #tpu.dot_dimension_numbers<[1], [0], [0], [1], [0, 0, 1, 1], [], []>} : vector<512x128xbf16>, vector<128x128xbf16>, vector<512x128xf32> -> vector<512x128xf32>
    %6 = arith.addf %2, %5 : vector<512x128xf32>
    %c0_8 = arith.constant 0 : index
    %c0_9 = arith.constant 0 : index
    %7 = vector.load %arg6[%c0_8, %c0_9] : memref<1x128xf32, #tpu.memory_space<vmem>>, vector<1x128xf32>
    %8 = vector.broadcast %7 : vector<1x128xf32> to vector<512x128xf32>
    %9 = arith.addf %6, %8 : vector<512x128xf32>
    %cst_10 = arith.constant 0.000000e+00 : f32
    %10 = vector.broadcast %cst_10 : f32 to vector<512x128xf32>
    %11 = arith.maximumf %9, %10 : vector<512x128xf32>
    %12 = arith.truncf %11 : vector<512x128xf32> to vector<512x128xbf16>
    %c0_11 = arith.constant 0 : index
    %c0_12 = arith.constant 0 : index
    %13 = vector.load %arg7[%c0_11, %c0_12] : memref<512x128xbf16, #tpu.memory_space<vmem>>, vector<512x128xbf16>
    tpu.vector_store %arg7[%c0_11, %c0_12], %12 {strides = array<i32>} : memref<512x128xbf16, #tpu.memory_space<vmem>>, vector<512x128xbf16>,
    return
  }
  func.func @transform_0(%arg0: i32, %arg1: i32) -> (i32, i32) {
    %c0_i32 = arith.constant 0 : i32
    %c0_i32_0 = arith.constant 0 : i32
    return %arg1, %c0_i32 : i32, i32
  }
  func.func @transform_1(%arg0: i32, %arg1: i32) -> (i32, i32) {
    %c0_i32 = arith.constant 0 : i32
    %c0_i32_0 = arith.constant 0 : i32
    return %c0_i32, %arg0 : i32, i32
  }
  func.func @transform_2(%arg0: i32, %arg1: i32) -> (i32, i32) {
    %c0_i32 = arith.constant 0 : i32
    %c0_i32_0 = arith.constant 0 : i32
    return %arg1, %c0_i32 : i32, i32
  }
  func.func @transform_3(%arg0: i32, %arg1: i32) -> (i32, i32) {
    %c0_i32 = arith.constant 0 : i32
    %c0_i32_0 = arith.constant 0 : i32
    return %c0_i32, %arg0 : i32, i32
  }
  func.func @transform_4(%arg0: i32, %arg1: i32) -> (i32, i32) {
    %c0_i32 = arith.constant 0 : i32
    %c0_i32_0 = arith.constant 0 : i32
    return %c0_i32, %arg0 : i32, i32
  }
  func.func @transform_5(%arg0: i32, %arg1: i32) -> (i32, i32) {
    %c0_i32 = arith.constant 0 : i32
    return %arg1, %arg0 : i32, i32
  }
}

</mosaic_0001>

<bundles_post_ra>
// kernel: block_forward_nhwc.2
= control target key start
LH: loop header
LB: loop body
LE: loop exit
PB: predicated region body
PF: predicated region fallthrough
CT: control target
= control target key end

     0   :  { %8 = vsyncpa [#allocation3], 0  ;;  %s1865_s0 = inlined_call_operand.hbm [shape: bf16[512,128], index: 0, kind: input, shape index: {}]   ;;  %s1866_s1 = inlined_call_operand.hbm [shape: bf16[128,128], index: 1, kind: input, shape index: {}]   ;;  %s1867_s2 = inlined_call_operand.hbm [shape: f32[1,128], index: 2, kind: input, shape index: {}]   ;;  %s1868_s3 = inlined_call_operand.hbm [shape: bf16[512,128], index: 3, kind: output, shape index: {}]  }
   0x1   :  { %9 = vsyncpa [#allocation6], 0 }
   0x2   :  { %10 = vsyncpa [#allocation4], 0  ;;  %s1709_s12 = smov [#allocation5]   ;;  %s1710_s14 = smov [#allocation2]  }
   0x3   :  { %s28_s13 = sshll.u32 %s1709_s12, 4  ;;  %s16_s15 = sshll.u32 %s1710_s14, 4  ;;  %s29_s13 = int_to_ptr.vmem [resolvable:$true] %s28_s13  ;;  %s1735_s15 = int_to_ptr.vmem [resolvable:$true] %s16_s15 }
   0x4   :  { %s1615_s18 = scalar_lea.hbm %s1866_s1, 1024 }
   0x5   :  { %p1616_p0 = scmp.ne.s32.totalorder %s1866_s1, %s1615_s18  ;;  %p1619_p1 = scmp.lt.u32.totalorder %s1615_s18, %s1866_s1 }
   0x7   :  { %p1621_p2 = pnand %p1619_p1, %p1616_p0 }
   0x9   :  { %1624 = shalt.err (!%p1621_p2)
}
   0xa   :  { %s1625_s23 = scalar_lea.vmem %s29_s13, 1024  ;;  %p1630_p4 = scmp.lt.s32.totalorder %s29_s13, %s29_s13 }
   0xb   :  { %p1626_p3 = scmp.ne.s32.totalorder %s29_s13, %s1625_s23  ;;  %p1631_p5 = scmp.lt.s32.totalorder %s1625_s23, %s1625_s23 }
   0xd   :  { %p1632_p6 = por %p1631_p5, %p1630_p4 }
   0xf   :  { %p1633_p7 = pnand %p1632_p6, %p1626_p3 }
  0x11   :  { %1636 = shalt.err (!%p1633_p7)
}
  0x12   :  { %s1711_s24 = smov 64   ;;  %s1712_s25 = smov 4  }
  0x13   :  { %34 = dma.hbm_to_vmem [thread:$0]  %s1866_s1, 1024, %s29_s13, [#allocation6], %s1711_s24, %s1711_s24, %s1712_s25  }
  0x14   :  { %s1637_s30 = scalar_lea.hbm %s1865_s0, 4096 }
  0x15   :  { %p1638_p8 = scmp.ne.s32.totalorder %s1865_s0, %s1637_s30  ;;  %p1641_p9 = scmp.lt.u32.totalorder %s1637_s30, %s1865_s0 }
  0x17   :  { %p1643_p10 = pnand %p1641_p9, %p1638_p8 }
  0x19   :  { %1646 = shalt.err (!%p1643_p10)
}
  0x1a   :  { %s1647_s8 = scalar_lea.vmem %s1735_s15, 4096  ;;  %p1652_p12 = scmp.lt.s32.totalorder %s1735_s15, %s1735_s15 }
  0x1b   :  { %p1648_p11 = scmp.ne.s32.totalorder %s1735_s15, %s1647_s8  ;;  %p1653_p13 = scmp.lt.s32.totalorder %s1647_s8, %s1647_s8 }
  0x1d   :  { %p1654_p0 = por %p1653_p13, %p1652_p12 }
  0x1f   :  { %p1655_p1 = pnand %p1654_p0, %p1648_p11 }
  0x21   :  { %1658 = shalt.err (!%p1655_p1)
}
  0x22   :  { %22 = dma.hbm_to_vmem [thread:$0]  %s1865_s0, 4096, %s1735_s15, [#allocation3], %s1711_s24, %s1711_s24, %s1712_s25  }
  0x23   :  { %s1713_s10 = smov [#allocation7]   ;;  %s1659_s14 = scalar_lea.hbm %s1867_s2, 16 }
  0x24   :  { %s41_s11 = sshll.u32 %s1713_s10, 4  ;;  %p1660_p2 = scmp.ne.s32.totalorder %s1867_s2, %s1659_s14  ;;  %s42_s11 = int_to_ptr.vmem [resolvable:$true] %s41_s11 }
  0x25   :  { %p1663_p3 = scmp.lt.u32.totalorder %s1659_s14, %s1867_s2 }
  0x27   :  { %p1665_p4 = pnand %p1663_p3, %p1660_p2 }
  0x29   :  { %1668 = shalt.err (!%p1665_p4)
}
  0x2a   :  { %s1669_s20 = scalar_lea.vmem %s42_s11, 16  ;;  %s1673_s0 = scalar_lea.vmem %s42_s11, 32 }
  0x2b   :  { %p1670_p5 = scmp.ne.s32.totalorder %s42_s11, %s1669_s20  ;;  %p1674_p6 = scmp.lt.s32.totalorder %s42_s11, %s42_s11 }
  0x2c   :  { %p1675_p7 = scmp.lt.s32.totalorder %s1673_s0, %s1669_s20 }
  0x2e   :  { %p1676_p8 = por %p1675_p7, %p1674_p6 }
  0x30   :  { %p1677_p9 = pnand %p1676_p8, %p1670_p5 }
  0x32   :  { %1680 = shalt.err (!%p1677_p9)
}
  0x33   :  { %44 = dma.hbm_to_vmem [thread:$0]  %s1867_s2, 16, %s42_s11, [#allocation6]  }
  0x34   :  { %1703 = dma.done.wait [#allocation3], 4096  }
  0x35   :  { %1704 = vsyncadd [#allocation3], 4294963200 }
  0x36   :  { %1705 = dma.done.wait [#allocation6], 1040  }
  0x37   :  { %1706 = vsyncadd [#allocation6], 4294966256  ;;  %v1575_v0 = vld [vmem:[#allocation5] sm:$0xff]   ;;  %v1576_v1 = vld [vmem:[#allocation5 + $0x8] sm:$0xff]   ;;  %s1714_s2 = smov [#allocation8]  }
  0x38   :  { %1473 = vmatprep.subr.bf16.mxu0 %v1575_v0  ;;  %1553 = vmatprep.subr.bf16.mxu1 %v1575_v0  ;;  %v1577_v2 = vld [vmem:[#allocation5 + $0x10] sm:$0xff]   ;;  %v1578_v3 = vld [vmem:[#allocation5 + $0x18] sm:$0xff]   ;;  %v1583_v4 = vld [vmem:[#allocation2] sm:$0xff]   ;;  %s1060_s22 = sshll.u32 %s1714_s2, 4  ;;  %s1061_s22 = int_to_ptr.vmem [resolvable:$true] %s1060_s22 }
  0x39   :  { %1474 = vmatpush3.bf16.msra.mxu0 %v1575_v0  ;;  %1561 = vmatpush3.bf16.msra.mxu1 %v1575_v0  ;;  %v1584_v5 = vld [vmem:[#allocation2 + $0x80] sm:$0xff]   ;;  %v1580_v7 = vld [vmem:[#allocation5 + $0x28] sm:$0xff]   ;;  %v1581_v8 = vld [vmem:[#allocation5 + $0x30] sm:$0xff]   ;;  %s1681_s23 = scalar_lea.vmem %s1061_s22, 4096  ;;  %p1686_p11 = scmp.lt.s32.totalorder %s1061_s22, %s1061_s22 }
  0x3a   :  { %1475 = vmatprep.subr.bf16.mxu0 %v1576_v1  ;;  %1554 = vmatprep.subr.bf16.mxu1 %v1576_v1  ;;  %v1579_v6 = vld [vmem:[#allocation5 + $0x20] sm:$0xff]   ;;  %v1582_v9 = vld [vmem:[#allocation5 + $0x38] sm:$0xff]   ;;  %v1585_v10 = vld [vmem:[#allocation2 + $0x8] sm:$0xff]   ;;  %p1682_p10 = scmp.ne.s32.totalorder %s1061_s22, %s1681_s23  ;;  %p1687_p12 = scmp.lt.s32.totalorder %s1681_s23, %s1681_s23 }
  0x3b   :  { %1489 = vmatprep.mubr.bf16.mxu0 %v1583_v4  ;;  %1521 = vmatprep.mubr.bf16.mxu1 %v1584_v5  ;;  %v1586_v11 = vld [vmem:[#allocation2 + $0x88] sm:$0xff]   ;;  %v1587_v12 = vld [vmem:[#allocation2 + $0x10] sm:$0xff]   ;;  %v1589_v14 = vld [vmem:[#allocation2 + $0x18] sm:$0xff]  }
  0x3c   :  { %v1588_v13 = vld [vmem:[#allocation2 + $0x90] sm:$0xff]   ;;  %v1590_v15 = vld [vmem:[#allocation2 + $0x98] sm:$0xff]   ;;  %v1591_v16 = vld [vmem:[#allocation2 + $0x20] sm:$0xff]   ;;  %p1688_p13 = por %p1687_p12, %p1686_p11 }
  0x3d   :  { %1476 = vmatpush3.bf16.msra.mxu0 %v1576_v1  ;;  %1562 = vmatpush3.bf16.msra.mxu1 %v1576_v1  ;;  %v1592_v17 = vld [vmem:[#allocation2 + $0xa0] sm:$0xff]   ;;  %v1593_v18 = vld [vmem:[#allocation2 + $0x28] sm:$0xff]   ;;  %v1595_v20 = vld [vmem:[#allocation2 + $0x30] sm:$0xff]  }
  0x3e   :  { %1477 = vmatprep.subr.bf16.mxu0 %v1577_v2  ;;  %1555 = vmatprep.subr.bf16.mxu1 %v1577_v2  ;;  %v1594_v19 = vld [vmem:[#allocation2 + $0xa8] sm:$0xff]   ;;  %v1596_v21 = vld [vmem:[#allocation2 + $0xb0] sm:$0xff]   ;;  %v1597_v22 = vld [vmem:[#allocation2 + $0x38] sm:$0xff]   ;;  %p1689_p0 = pnand %p1688_p13, %p1682_p10 }
  0x3f   :  { %v1598_v23 = vld [vmem:[#allocation2 + $0xb8] sm:$0xff]   ;;  %v1599_v24 = vld [vmem:[#allocation2 + $0x40] sm:$0xff]   ;;  %v1601_v26 = vld [vmem:[#allocation2 + $0x48] sm:$0xff]  }
  0x40   :  { %v1600_v25 = vld [vmem:[#allocation2 + $0xc0] sm:$0xff]   ;;  %v1602_v27 = vld [vmem:[#allocation2 + $0xc8] sm:$0xff]   ;;  %v1603_v28 = vld [vmem:[#allocation2 + $0x50] sm:$0xff]  }
  0x41   :  { %1478 = vmatpush3.bf16.msra.mxu0 %v1577_v2  ;;  %1563 = vmatpush3.bf16.msra.mxu1 %v1577_v2  ;;  %v1604_v29 = vld [vmem:[#allocation2 + $0xd0] sm:$0xff]   ;;  %v1605_v30 = vld [vmem:[#allocation2 + $0x58] sm:$0xff]   ;;  %v1607_v32 = vld [vmem:[#allocation2 + $0x60] sm:$0xff]  }
  0x42   :  { %1479 = vmatprep.subr.bf16.mxu0 %v1578_v3  ;;  %1556 = vmatprep.subr.bf16.mxu1 %v1578_v3  ;;  %v1606_v31 = vld [vmem:[#allocation2 + $0xd8] sm:$0xff]   ;;  %v1608_v33 = vld [vmem:[#allocation2 + $0xe0] sm:$0xff]   ;;  %v1609_v34 = vld [vmem:[#allocation2 + $0x68] sm:$0xff]  }
  0x43   :  { %v1610_v35 = vld [vmem:[#allocation2 + $0xe8] sm:$0xff]   ;;  %v1611_v36 = vld [vmem:[#allocation2 + $0x70] sm:$0xff]   ;;  %v1613_v38 = vld [vmem:[#allocation2 + $0x78] sm:$0xff]  }
  0x44   :  { %v1612_v37 = vld [vmem:[#allocation2 + $0xf0] sm:$0xff]   ;;  %v1614_v39 = vld [vmem:[#allocation2 + $0xf8] sm:$0xff]   ;;  %v1784_v40 = vld [vmem:[#allocation7] ss:$0 sm:$0xff] }
  0x45   :  { %1480 = vmatpush3.bf16.msra.mxu0 %v1578_v3  ;;  %1564 = vmatpush3.bf16.msra.mxu1 %v1578_v3 }
  0x46   :  { %1481 = vmatprep.subr.bf16.mxu0 %v1579_v6  ;;  %1557 = vmatprep.subr.bf16.mxu1 %v1579_v6 }
  0x49   :  { %1482 = vmatpush3.bf16.msra.mxu0 %v1579_v6  ;;  %1565 = vmatpush3.bf16.msra.mxu1 %v1579_v6 }
  0x4a   :  { %1483 = vmatprep.subr.bf16.mxu0 %v1580_v7  ;;  %1558 = vmatprep.subr.bf16.mxu1 %v1580_v7 }
  0x4d   :  { %1484 = vmatpush3.bf16.msra.mxu0 %v1580_v7  ;;  %1566 = vmatpush3.bf16.msra.mxu1 %v1580_v7 }
  0x4e   :  { %1485 = vmatprep.subr.bf16.mxu0 %v1581_v8  ;;  %1559 = vmatprep.subr.bf16.mxu1 %v1581_v8 }
  0x51   :  { %1486 = vmatpush3.bf16.msra.mxu0 %v1581_v8  ;;  %1567 = vmatpush3.bf16.msra.mxu1 %v1581_v8 }
  0x52   :  { %1487 = vmatprep.subr.bf16.mxu0 %v1582_v9  ;;  %1560 = vmatprep.subr.bf16.mxu1 %v1582_v9 }
  0x55   :  { %1488 = vmatpush3.bf16.msra.mxu0 %v1582_v9  ;;  %1568 = vmatpush3.bf16.msra.mxu1 %v1582_v9 }
  0x58   :  { %1490 = vmatmul.mubr.bf16.vlgmr.msra.gmra.mrb[0].mxu0 %v1585_v10  ;;  %1522 = vmatmul.mubr.bf16.vlgmr.msra.gmra.mrb[0].mxu1 %v1586_v11 }
  0x59   :  { %1493 = vmatprep.mubr.bf16.mxu0 %v1587_v12  ;;  %1525 = vmatprep.mubr.bf16.mxu1 %v1588_v13 }
  0x60   :  { %1494 = vmatmul.mubr.bf16.gmra.mrb[4].mxu0 %v1589_v14  ;;  %1526 = vmatmul.mubr.bf16.gmra.mrb[4].mxu1 %v1590_v15 }
  0x61   :  { %1497 = vmatprep.mubr.bf16.mxu0 %v1591_v16  ;;  %1529 = vmatprep.mubr.bf16.mxu1 %v1592_v17 }
  0x68   :  { %1498 = vmatmul.mubr.bf16.gmra.mrb[8].mxu0 %v1593_v18  ;;  %1530 = vmatmul.mubr.bf16.gmra.mrb[8].mxu1 %v1594_v19 }
  0x69   :  { %1501 = vmatprep.mubr.bf16.mxu0 %v1595_v20  ;;  %1533 = vmatprep.mubr.bf16.mxu1 %v1596_v21 }
  0x70   :  { %1502 = vmatmul.mubr.bf16.gmra.mrb[12].mxu0 %v1597_v22  ;;  %1534 = vmatmul.mubr.bf16.gmra.mrb[12].mxu1 %v1598_v23 }
  0x71   :  { %1505 = vmatprep.mubr.bf16.mxu0 %v1599_v24  ;;  %1537 = vmatprep.mubr.bf16.mxu1 %v1600_v25 }
  0x78   :  { %1506 = vmatmul.mubr.bf16.gmra.mrb[16].mxu0 %v1601_v26  ;;  %1538 = vmatmul.mubr.bf16.gmra.mrb[16].mxu1 %v1602_v27 }
  0x79   :  { %1509 = vmatprep.mubr.bf16.mxu0 %v1603_v28  ;;  %1541 = vmatprep.mubr.bf16.mxu1 %v1604_v29 }
  0x80   :  { %1510 = vmatmul.mubr.bf16.gmra.mrb[20].mxu0 %v1605_v30  ;;  %1542 = vmatmul.mubr.bf16.gmra.mrb[20].mxu1 %v1606_v31 }
  0x81   :  { %1513 = vmatprep.mubr.bf16.mxu0 %v1607_v32  ;;  %1545 = vmatprep.mubr.bf16.mxu1 %v1608_v33 }
  0x88   :  { %1514 = vmatmul.mubr.bf16.gmra.mrb[24].mxu0 %v1609_v34  ;;  %1546 = vmatmul.mubr.bf16.gmra.mrb[24].mxu1 %v1610_v35 }
  0x89   :  { %1517 = vmatprep.mubr.bf16.mxu0 %v1611_v36  ;;  %1549 = vmatprep.mubr.bf16.mxu1 %v1612_v37 }
  0x90   :  { %1518 = vmatmul.mubr.bf16.gmra.mrb[28].mxu0 %v1613_v38  ;;  %1550 = vmatmul.mubr.bf16.gmra.mrb[28].mxu1 %v1614_v39 }
 0x12b   :  { %v1491_v41 = vpop.f32.mrb[0].mxu0  ;;  %v1523_v42 = vpop.f32.mrb[0].mxu1 }
 0x12c   :  { %v425_v43 = vadd.f32 %v1491_v41, %v1784_v40  ;;  %v553_v44 = vadd.f32 %v1523_v42, %v1784_v40  ;;  %v416_v45 = vpop.f32.mrb[1].mxu0  ;;  %v544_v46 = vpop.f32.mrb[1].mxu1 }
 0x12d   :  { %v417_v47 = vadd.f32 %v1784_v40, %v416_v45  ;;  %v545_v48 = vadd.f32 %v1784_v40, %v544_v46  ;;  %v1492_v49 = vpop.f32.mrb[2].mxu0  ;;  %v1524_v50 = vpop.f32.mrb[2].mxu1 }
 0x12e   :  { %v428_v51 = vadd.f32 %v1492_v49, %v1784_v40  ;;  %v556_v52 = vadd.f32 %v1524_v50, %v1784_v40  ;;  %v419_v53 = vpop.f32.mrb[3].mxu0  ;;  %v547_v54 = vpop.f32.mrb[3].mxu1  ;;  %v673_v57 = vmax.f32 %v425_v43, 0.0  ;;  %v705_v58 = vmax.f32 %v553_v44, 0.0 }
 0x12f   :  { %v420_v55 = vadd.f32 %v1784_v40, %v419_v53  ;;  %v548_v56 = vadd.f32 %v1784_v40, %v547_v54  ;;  %v671_v61 = vmax.f32 %v417_v47, 0.0  ;;  %v703_v62 = vmax.f32 %v545_v48, 0.0 }
 0x130   :  { %v674_v59 = vmax.f32 %v428_v51, 0.0  ;;  %v706_v60 = vmax.f32 %v556_v52, 0.0 }
 0x131   :  { %v672_v63 = vmax.f32 %v420_v55, 0.0  ;;  %v704_v0 = vmax.f32 %v548_v56, 0.0 }
 0x132   :  { %v1250_v1 = vpack.c.bf16 %v674_v59, %v673_v57  ;;  %v1330_v2 = vpack.c.bf16 %v706_v60, %v705_v58 }
 0x133   :  { %v1245_v3 = vpack.c.bf16 %v672_v63, %v671_v61  ;;  %v1325_v4 = vpack.c.bf16 %v704_v0, %v703_v62  ;;  %v1495_v5 = vpop.f32.mrb[4].mxu0  ;;  %v1527_v6 = vpop.f32.mrb[4].mxu1 }
 0x134   :  { %1402 = vst [vmem:[#allocation8 + $0x8] sm:$0xff] %v1250_v1   ;;  %1418 = vst [vmem:[#allocation8 + $0x88] sm:$0xff] %v1330_v2   ;;  %v441_v7 = vadd.f32 %v1495_v5, %v1784_v40  ;;  %v569_v8 = vadd.f32 %v1527_v6, %v1784_v40  ;;  %v432_v9 = vpop.f32.mrb[5].mxu0  ;;  %v560_v10 = vpop.f32.mrb[5].mxu1 }
 0x135   :  { %1246 = vst [vmem:[#allocation8] sm:$0xff] %v1245_v3   ;;  %1417 = vst [vmem:[#allocation8 + $0x80] sm:$0xff] %v1325_v4   ;;  %v433_v11 = vadd.f32 %v1784_v40, %v432_v9  ;;  %v561_v12 = vadd.f32 %v1784_v40, %v560_v10  ;;  %v1496_v13 = vpop.f32.mrb[6].mxu0  ;;  %v1528_v14 = vpop.f32.mrb[6].mxu1 }
 0x136   :  { %v444_v15 = vadd.f32 %v1496_v13, %v1784_v40  ;;  %v572_v16 = vadd.f32 %v1528_v14, %v1784_v40  ;;  %v435_v17 = vpop.f32.mrb[7].mxu0  ;;  %v563_v18 = vpop.f32.mrb[7].mxu1  ;;  %v677_v21 = vmax.f32 %v441_v7, 0.0  ;;  %v709_v22 = vmax.f32 %v569_v8, 0.0 }
 0x137   :  { %v436_v19 = vadd.f32 %v1784_v40, %v435_v17  ;;  %v564_v20 = vadd.f32 %v1784_v40, %v563_v18  ;;  %v675_v25 = vmax.f32 %v433_v11, 0.0  ;;  %v707_v26 = vmax.f32 %v561_v12, 0.0 }
 0x138   :  { %v678_v23 = vmax.f32 %v444_v15, 0.0  ;;  %v710_v24 = vmax.f32 %v572_v16, 0.0 }
 0x139   :  { %v676_v27 = vmax.f32 %v436_v19, 0.0  ;;  %v708_v28 = vmax.f32 %v564_v20, 0.0 }
 0x13a   :  { %v1260_v29 = vpack.c.bf16 %v678_v23, %v677_v21  ;;  %v1340_v30 = vpack.c.bf16 %v710_v24, %v709_v22 }
 0x13b   :  { %v1255_v31 = vpack.c.bf16 %v676_v27, %v675_v25  ;;  %v1335_v32 = vpack.c.bf16 %v708_v28, %v707_v26  ;;  %v1499_v33 = vpop.f32.mrb[8].mxu0  ;;  %v1531_v34 = vpop.f32.mrb[8].mxu1 }
 0x13c   :  { %1404 = vst [vmem:[#allocation8 + $0x18] sm:$0xff] %v1260_v29   ;;  %1420 = vst [vmem:[#allocation8 + $0x98] sm:$0xff] %v1340_v30   ;;  %v457_v35 = vadd.f32 %v1499_v33, %v1784_v40  ;;  %v585_v36 = vadd.f32 %v1531_v34, %v1784_v40  ;;  %v448_v37 = vpop.f32.mrb[9].mxu0  ;;  %v576_v38 = vpop.f32.mrb[9].mxu1 }
 0x13d   :  { %1403 = vst [vmem:[#allocation8 + $0x10] sm:$0xff] %v1255_v31   ;;  %1419 = vst [vmem:[#allocation8 + $0x90] sm:$0xff] %v1335_v32   ;;  %v449_v39 = vadd.f32 %v1784_v40, %v448_v37  ;;  %v577_v41 = vadd.f32 %v1784_v40, %v576_v38  ;;  %v1500_v42 = vpop.f32.mrb[10].mxu0  ;;  %v1532_v43 = vpop.f32.mrb[10].mxu1 }
 0x13e   :  { %v460_v44 = vadd.f32 %v1500_v42, %v1784_v40  ;;  %v588_v45 = vadd.f32 %v1532_v43, %v1784_v40  ;;  %v451_v46 = vpop.f32.mrb[11].mxu0  ;;  %v579_v47 = vpop.f32.mrb[11].mxu1  ;;  %v681_v50 = vmax.f32 %v457_v35, 0.0  ;;  %v713_v51 = vmax.f32 %v585_v36, 0.0 }
 0x13f   :  { %v452_v48 = vadd.f32 %v1784_v40, %v451_v46  ;;  %v580_v49 = vadd.f32 %v1784_v40, %v579_v47  ;;  %v679_v54 = vmax.f32 %v449_v39, 0.0  ;;  %v711_v55 = vmax.f32 %v577_v41, 0.0 }
 0x140   :  { %v682_v52 = vmax.f32 %v460_v44, 0.0  ;;  %v714_v53 = vmax.f32 %v588_v45, 0.0 }
 0x141   :  { %v680_v56 = vmax.f32 %v452_v48, 0.0  ;;  %v712_v57 = vmax.f32 %v580_v49, 0.0 }
 0x142   :  { %v1270_v58 = vpack.c.bf16 %v682_v52, %v681_v50  ;;  %v1350_v59 = vpack.c.bf16 %v714_v53, %v713_v51 }
 0x143   :  { %v1265_v60 = vpack.c.bf16 %v680_v56, %v679_v54  ;;  %v1345_v61 = vpack.c.bf16 %v712_v57, %v711_v55  ;;  %v1503_v62 = vpop.f32.mrb[12].mxu0  ;;  %v1535_v63 = vpop.f32.mrb[12].mxu1 }
 0x144   :  { %1406 = vst [vmem:[#allocation8 + $0x28] sm:$0xff] %v1270_v58   ;;  %1422 = vst [vmem:[#allocation8 + $0xa8] sm:$0xff] %v1350_v59   ;;  %v473_v0 = vadd.f32 %v1503_v62, %v1784_v40  ;;  %v601_v1 = vadd.f32 %v1535_v63, %v1784_v40  ;;  %v464_v2 = vpop.f32.mrb[13].mxu0  ;;  %v592_v3 = vpop.f32.mrb[13].mxu1 }
 0x145   :  { %1405 = vst [vmem:[#allocation8 + $0x20] sm:$0xff] %v1265_v60   ;;  %1421 = vst [vmem:[#allocation8 + $0xa0] sm:$0xff] %v1345_v61   ;;  %v465_v4 = vadd.f32 %v1784_v40, %v464_v2  ;;  %v593_v5 = vadd.f32 %v1784_v40, %v592_v3  ;;  %v1504_v6 = vpop.f32.mrb[14].mxu0  ;;  %v1536_v7 = vpop.f32.mrb[14].mxu1 }
 0x146   :  { %v476_v8 = vadd.f32 %v1504_v6, %v1784_v40  ;;  %v604_v9 = vadd.f32 %v1536_v7, %v1784_v40  ;;  %v467_v10 = vpop.f32.mrb[15].mxu0  ;;  %v595_v11 = vpop.f32.mrb[15].mxu1  ;;  %v685_v14 = vmax.f32 %v473_v0, 0.0  ;;  %v717_v15 = vmax.f32 %v601_v1, 0.0 }
 0x147   :  { %v468_v12 = vadd.f32 %v1784_v40, %v467_v10  ;;  %v596_v13 = vadd.f32 %v1784_v40, %v595_v11  ;;  %v683_v18 = vmax.f32 %v465_v4, 0.0  ;;  %v715_v19 = vmax.f32 %v593_v5, 0.0 }
 0x148   :  { %v686_v16 = vmax.f32 %v476_v8, 0.0  ;;  %v718_v17 = vmax.f32 %v604_v9, 0.0 }
 0x149   :  { %v684_v20 = vmax.f32 %v468_v12, 0.0  ;;  %v716_v21 = vmax.f32 %v596_v13, 0.0 }
 0x14a   :  { %v1280_v22 = vpack.c.bf16 %v686_v16, %v685_v14  ;;  %v1360_v23 = vpack.c.bf16 %v718_v17, %v717_v15 }
 0x14b   :  { %v1275_v24 = vpack.c.bf16 %v684_v20, %v683_v18  ;;  %v1355_v25 = vpack.c.bf16 %v716_v21, %v715_v19  ;;  %v1507_v26 = vpop.f32.mrb[16].mxu0  ;;  %v1539_v27 = vpop.f32.mrb[16].mxu1 }
 0x14c   :  { %1408 = vst [vmem:[#allocation8 + $0x38] sm:$0xff] %v1280_v22   ;;  %1424 = vst [vmem:[#allocation8 + $0xb8] sm:$0xff] %v1360_v23   ;;  %v489_v28 = vadd.f32 %v1507_v26, %v1784_v40  ;;  %v617_v29 = vadd.f32 %v1539_v27, %v1784_v40  ;;  %v480_v30 = vpop.f32.mrb[17].mxu0  ;;  %v608_v31 = vpop.f32.mrb[17].mxu1 }
 0x14d   :  { %1407 = vst [vmem:[#allocation8 + $0x30] sm:$0xff] %v1275_v24   ;;  %1423 = vst [vmem:[#allocation8 + $0xb0] sm:$0xff] %v1355_v25   ;;  %v481_v32 = vadd.f32 %v1784_v40, %v480_v30  ;;  %v609_v33 = vadd.f32 %v1784_v40, %v608_v31  ;;  %v1508_v34 = vpop.f32.mrb[18].mxu0  ;;  %v1540_v35 = vpop.f32.mrb[18].mxu1 }
 0x14e   :  { %v492_v36 = vadd.f32 %v1508_v34, %v1784_v40  ;;  %v620_v37 = vadd.f32 %v1540_v35, %v1784_v40  ;;  %v483_v38 = vpop.f32.mrb[19].mxu0  ;;  %v611_v39 = vpop.f32.mrb[19].mxu1  ;;  %v689_v43 = vmax.f32 %v489_v28, 0.0  ;;  %v721_v44 = vmax.f32 %v617_v29, 0.0 }
 0x14f   :  { %v484_v41 = vadd.f32 %v1784_v40, %v483_v38  ;;  %v612_v42 = vadd.f32 %v1784_v40, %v611_v39  ;;  %v687_v47 = vmax.f32 %v481_v32, 0.0  ;;  %v719_v48 = vmax.f32 %v609_v33, 0.0 }
 0x150   :  { %v690_v45 = vmax.f32 %v492_v36, 0.0  ;;  %v722_v46 = vmax.f32 %v620_v37, 0.0 }
 0x151   :  { %v688_v49 = vmax.f32 %v484_v41, 0.0  ;;  %v720_v50 = vmax.f32 %v612_v42, 0.0 }
 0x152   :  { %v1290_v51 = vpack.c.bf16 %v690_v45, %v689_v43  ;;  %v1370_v52 = vpack.c.bf16 %v722_v46, %v721_v44 }
 0x153   :  { %v1285_v53 = vpack.c.bf16 %v688_v49, %v687_v47  ;;  %v1365_v54 = vpack.c.bf16 %v720_v50, %v719_v48  ;;  %v1511_v55 = vpop.f32.mrb[20].mxu0  ;;  %v1543_v56 = vpop.f32.mrb[20].mxu1 }
 0x154   :  { %1410 = vst [vmem:[#allocation8 + $0x48] sm:$0xff] %v1290_v51   ;;  %1426 = vst [vmem:[#allocation8 + $0xc8] sm:$0xff] %v1370_v52   ;;  %v505_v57 = vadd.f32 %v1511_v55, %v1784_v40  ;;  %v633_v58 = vadd.f32 %v1543_v56, %v1784_v40  ;;  %v496_v59 = vpop.f32.mrb[21].mxu0  ;;  %v624_v60 = vpop.f32.mrb[21].mxu1 }
 0x155   :  { %1409 = vst [vmem:[#allocation8 + $0x40] sm:$0xff] %v1285_v53   ;;  %1425 = vst [vmem:[#allocation8 + $0xc0] sm:$0xff] %v1365_v54   ;;  %v497_v61 = vadd.f32 %v1784_v40, %v496_v59  ;;  %v625_v62 = vadd.f32 %v1784_v40, %v624_v60  ;;  %v1512_v63 = vpop.f32.mrb[22].mxu0  ;;  %v1544_v0 = vpop.f32.mrb[22].mxu1 }
 0x156   :  { %v508_v1 = vadd.f32 %v1512_v63, %v1784_v40  ;;  %v636_v2 = vadd.f32 %v1544_v0, %v1784_v40  ;;  %v499_v3 = vpop.f32.mrb[23].mxu0  ;;  %v627_v4 = vpop.f32.mrb[23].mxu1  ;;  %v693_v7 = vmax.f32 %v505_v57, 0.0  ;;  %v725_v8 = vmax.f32 %v633_v58, 0.0 }
 0x157   :  { %v500_v5 = vadd.f32 %v1784_v40, %v499_v3  ;;  %v628_v6 = vadd.f32 %v1784_v40, %v627_v4  ;;  %v691_v11 = vmax.f32 %v497_v61, 0.0  ;;  %v723_v12 = vmax.f32 %v625_v62, 0.0 }
 0x158   :  { %v694_v9 = vmax.f32 %v508_v1, 0.0  ;;  %v726_v10 = vmax.f32 %v636_v2, 0.0 }
 0x159   :  { %v692_v13 = vmax.f32 %v500_v5, 0.0  ;;  %v724_v14 = vmax.f32 %v628_v6, 0.0 }
 0x15a   :  { %v1300_v15 = vpack.c.bf16 %v694_v9, %v693_v7  ;;  %v1380_v16 = vpack.c.bf16 %v726_v10, %v725_v8 }
 0x15b   :  { %v1295_v17 = vpack.c.bf16 %v692_v13, %v691_v11  ;;  %v1375_v18 = vpack.c.bf16 %v724_v14, %v723_v12  ;;  %v1515_v19 = vpop.f32.mrb[24].mxu0  ;;  %v1547_v20 = vpop.f32.mrb[24].mxu1 }
 0x15c   :  { %1412 = vst [vmem:[#allocation8 + $0x58] sm:$0xff] %v1300_v15   ;;  %1428 = vst [vmem:[#allocation8 + $0xd8] sm:$0xff] %v1380_v16   ;;  %v521_v21 = vadd.f32 %v1515_v19, %v1784_v40  ;;  %v649_v22 = vadd.f32 %v1547_v20, %v1784_v40  ;;  %v512_v23 = vpop.f32.mrb[25].mxu0  ;;  %v640_v24 = vpop.f32.mrb[25].mxu1 }
 0x15d   :  { %1411 = vst [vmem:[#allocation8 + $0x50] sm:$0xff] %v1295_v17   ;;  %1427 = vst [vmem:[#allocation8 + $0xd0] sm:$0xff] %v1375_v18   ;;  %v513_v25 = vadd.f32 %v1784_v40, %v512_v23  ;;  %v641_v26 = vadd.f32 %v1784_v40, %v640_v24  ;;  %v1516_v27 = vpop.f32.mrb[26].mxu0  ;;  %v1548_v28 = vpop.f32.mrb[26].mxu1 }
 0x15e   :  { %v524_v29 = vadd.f32 %v1516_v27, %v1784_v40  ;;  %v652_v30 = vadd.f32 %v1548_v28, %v1784_v40  ;;  %v515_v31 = vpop.f32.mrb[27].mxu0  ;;  %v643_v32 = vpop.f32.mrb[27].mxu1  ;;  %v697_v35 = vmax.f32 %v521_v21, 0.0  ;;  %v729_v36 = vmax.f32 %v649_v22, 0.0 }
 0x15f   :  { %v516_v33 = vadd.f32 %v1784_v40, %v515_v31  ;;  %v644_v34 = vadd.f32 %v1784_v40, %v643_v32  ;;  %v695_v39 = vmax.f32 %v513_v25, 0.0  ;;  %v727_v41 = vmax.f32 %v641_v26, 0.0 }
 0x160   :  { %v698_v37 = vmax.f32 %v524_v29, 0.0  ;;  %v730_v38 = vmax.f32 %v652_v30, 0.0 }
 0x161   :  { %v696_v42 = vmax.f32 %v516_v33, 0.0  ;;  %v728_v43 = vmax.f32 %v644_v34, 0.0 }
 0x162   :  { %v1310_v44 = vpack.c.bf16 %v698_v37, %v697_v35  ;;  %v1390_v45 = vpack.c.bf16 %v730_v38, %v729_v36 }
 0x163   :  { %v1305_v46 = vpack.c.bf16 %v696_v42, %v695_v39  ;;  %v1385_v47 = vpack.c.bf16 %v728_v43, %v727_v41  ;;  %v1519_v48 = vpop.f32.mrb[28].mxu0  ;;  %v1551_v49 = vpop.f32.mrb[28].mxu1 }
 0x164   :  { %1414 = vst [vmem:[#allocation8 + $0x68] sm:$0xff] %v1310_v44   ;;  %1430 = vst [vmem:[#allocation8 + $0xe8] sm:$0xff] %v1390_v45   ;;  %v537_v50 = vadd.f32 %v1519_v48, %v1784_v40  ;;  %v665_v51 = vadd.f32 %v1551_v49, %v1784_v40  ;;  %v528_v52 = vpop.f32.mrb[29].mxu0  ;;  %v656_v53 = vpop.f32.mrb[29].mxu1 }
 0x165   :  { %1413 = vst [vmem:[#allocation8 + $0x60] sm:$0xff] %v1305_v46   ;;  %1429 = vst [vmem:[#allocation8 + $0xe0] sm:$0xff] %v1385_v47   ;;  %v529_v54 = vadd.f32 %v1784_v40, %v528_v52  ;;  %v657_v55 = vadd.f32 %v1784_v40, %v656_v53  ;;  %v1520_v56 = vpop.f32.mrb[30].mxu0  ;;  %v1552_v57 = vpop.f32.mrb[30].mxu1 }
 0x166   :  { %v540_v58 = vadd.f32 %v1520_v56, %v1784_v40  ;;  %v668_v59 = vadd.f32 %v1552_v57, %v1784_v40  ;;  %v531_v60 = vpop.f32.mrb[31].mxu0  ;;  %v659_v61 = vpop.f32.mrb[31].mxu1  ;;  %v701_v0 = vmax.f32 %v537_v50, 0.0  ;;  %v733_v1 = vmax.f32 %v665_v51, 0.0 }
 0x167   :  { %v532_v62 = vadd.f32 %v1784_v40, %v531_v60  ;;  %v660_v63 = vadd.f32 %v1784_v40, %v659_v61  ;;  %v699_v4 = vmax.f32 %v529_v54, 0.0  ;;  %v731_v5 = vmax.f32 %v657_v55, 0.0 }
 0x168   :  { %v702_v2 = vmax.f32 %v540_v58, 0.0  ;;  %v734_v3 = vmax.f32 %v668_v59, 0.0 }
 0x169   :  { %v700_v6 = vmax.f32 %v532_v62, 0.0  ;;  %v732_v7 = vmax.f32 %v660_v63, 0.0 }
 0x16a   :  { %v1320_v8 = vpack.c.bf16 %v702_v2, %v701_v0  ;;  %v1400_v9 = vpack.c.bf16 %v734_v3, %v733_v1 }
 0x16b   :  { %v1315_v10 = vpack.c.bf16 %v700_v6, %v699_v4  ;;  %v1395_v11 = vpack.c.bf16 %v732_v7, %v731_v5 }
 0x16c   :  { %1416 = vst [vmem:[#allocation8 + $0x78] sm:$0xff] %v1320_v8   ;;  %1432 = vst [vmem:[#allocation8 + $0xf8] sm:$0xff] %v1400_v9  }
 0x16d   :  { %1415 = vst [vmem:[#allocation8 + $0x70] sm:$0xff] %v1315_v10   ;;  %1431 = vst [vmem:[#allocation8 + $0xf0] sm:$0xff] %v1395_v11  }
 0x16e   :  { %1692 = shalt.err (!%p1689_p0)
}
 0x16f   :  { %s1693_s28 = scalar_lea.hbm %s1868_s3, 4096 }
 0x170   :  { %p1694_p1 = scmp.ne.s32.totalorder %s1868_s3, %s1693_s28  ;;  %p1697_p2 = scmp.lt.u32.totalorder %s1693_s28, %s1868_s3 }
 0x172   :  { %p1699_p3 = pnand %p1697_p2, %p1694_p1 }
 0x174   :  { %1702 = shalt.err (!%p1699_p3)
}
 0x175   :  { %1066 = dma.vmem_to_hbm [thread:$0]  %s1061_s22, 4096, %s1868_s3, [#allocation4], %s1711_s24, %s1711_s24, %s1712_s25  }
 0x176   :  { %1707 = dma.done.wait [#allocation4], 4096  }
 0x177   :  { %1708 = vsyncadd [#allocation4], 4294963200 }
 0x178   :  { %1070 = vsyncpa [#allocation3], 1 }
 0x179   :  { %1071 = vsyncpa [#allocation6], 1 }
 0x17a   :  { %1072 = vsyncpa [#allocation4], 1 }

// kernel: block_forward_nhwc.3
= control target key start
LH: loop header
LB: loop body
LE: loop exit
PB: predicated region body
PF: predicated region fallthrough
CT: control target
= control target key end

     0   :  { %10 = vsyncpa [#allocation3], 0  ;;  %s2917_s0 = inlined_call_operand.hbm [shape: bf16[512,128], index: 0, kind: input, shape index: {}]   ;;  %s2918_s1 = inlined_call_operand.hbm [shape: bf16[128,128], index: 1, kind: input, shape index: {}]   ;;  %s2919_s2 = inlined_call_operand.hbm [shape: bf16[512,128], index: 2, kind: input, shape index: {}]   ;;  %s2920_s3 = inlined_call_operand.hbm [shape: bf16[128,128], index: 3, kind: input, shape index: {}]   ;;  %s2921_s4 = inlined_call_operand.hbm [shape: f32[1,128], index: 4, kind: input, shape index: {}]   ;;  %s2922_s5 = inlined_call_operand.hbm [shape: bf16[512,128], index: 5, kind: output, shape index: {}]  }
   0x1   :  { %11 = vsyncpa [#allocation6], 0 }
   0x2   :  { %12 = vsyncpa [#allocation9], 0 }
   0x3   :  { %13 = vsyncpa [#allocation4], 0  ;;  %s2712_s18 = smov [#allocation5]   ;;  %s2713_s20 = smov [#allocation8]  }
   0x4   :  { %s31_s19 = sshll.u32 %s2712_s18, 4  ;;  %s55_s21 = sshll.u32 %s2713_s20, 4  ;;  %s32_s19 = int_to_ptr.vmem [resolvable:$true] %s31_s19  ;;  %s2750_s21 = int_to_ptr.vmem [resolvable:$true] %s55_s21 }
   0x5   :  { %s2572_s24 = scalar_lea.hbm %s2918_s1, 1024 }
   0x6   :  { %p2573_p0 = scmp.ne.s32.totalorder %s2918_s1, %s2572_s24  ;;  %p2576_p1 = scmp.lt.u32.totalorder %s2572_s24, %s2918_s1 }
   0x8   :  { %p2578_p2 = pnand %p2576_p1, %p2573_p0 }
   0xa   :  { %2581 = shalt.err (!%p2578_p2)
}
   0xb   :  { %s2582_s29 = scalar_lea.vmem %s32_s19, 1024  ;;  %p2587_p4 = scmp.lt.s32.totalorder %s32_s19, %s32_s19 }
   0xc   :  { %p2583_p3 = scmp.ne.s32.totalorder %s32_s19, %s2582_s29  ;;  %p2588_p5 = scmp.lt.s32.totalorder %s2582_s29, %s2582_s29 }
   0xe   :  { %p2589_p6 = por %p2588_p5, %p2587_p4 }
  0x10   :  { %p2590_p7 = pnand %p2589_p6, %p2583_p3 }
  0x12   :  { %2593 = shalt.err (!%p2590_p7)
}
  0x13   :  { %s2714_s30 = smov 64   ;;  %s2715_s6 = smov 4  }
  0x14   :  { %37 = dma.hbm_to_vmem [thread:$0]  %s2918_s1, 1024, %s32_s19, [#allocation6], %s2714_s30, %s2714_s30, %s2715_s6  }
  0x15   :  { %s2594_s11 = scalar_lea.hbm %s2920_s3, 1024 }
  0x16   :  { %p2595_p8 = scmp.ne.s32.totalorder %s2920_s3, %s2594_s11  ;;  %p2598_p9 = scmp.lt.u32.totalorder %s2594_s11, %s2920_s3 }
  0x18   :  { %p2600_p10 = pnand %p2598_p9, %p2595_p8 }
  0x1a   :  { %2603 = shalt.err (!%p2600_p10)
}
  0x1b   :  { %s2604_s16 = scalar_lea.vmem %s2750_s21, 1024  ;;  %p2609_p12 = scmp.lt.s32.totalorder %s2750_s21, %s2750_s21 }
  0x1c   :  { %p2605_p11 = scmp.ne.s32.totalorder %s2750_s21, %s2604_s16  ;;  %p2610_p13 = scmp.lt.s32.totalorder %s2604_s16, %s2604_s16 }
  0x1e   :  { %p2611_p0 = por %p2610_p13, %p2609_p12 }
  0x20   :  { %p2612_p1 = pnand %p2611_p0, %p2605_p11 }
  0x22   :  { %2615 = shalt.err (!%p2612_p1)
}
  0x23   :  { %61 = dma.hbm_to_vmem [thread:$0]  %s2920_s3, 1024, %s2750_s21, [#allocation9], %s2714_s30, %s2714_s30, %s2715_s6  }
  0x24   :  { %s2716_s18 = smov [#allocation2]   ;;  %s2717_s20 = smov [#allocation7]  }
  0x25   :  { %s19_s19 = sshll.u32 %s2716_s18, 4  ;;  %s43_s22 = sshll.u32 %s2717_s20, 4  ;;  %s20_s19 = int_to_ptr.vmem [resolvable:$true] %s19_s19  ;;  %s2787_s22 = int_to_ptr.vmem [resolvable:$true] %s43_s22 }
  0x26   :  { %s2616_s25 = scalar_lea.hbm %s2917_s0, 4096 }
  0x27   :  { %p2617_p2 = scmp.ne.s32.totalorder %s2917_s0, %s2616_s25  ;;  %p2620_p3 = scmp.lt.u32.totalorder %s2616_s25, %s2917_s0 }
  0x29   :  { %p2622_p4 = pnand %p2620_p3, %p2617_p2 }
  0x2b   :  { %2625 = shalt.err (!%p2622_p4)
}
  0x2c   :  { %s2626_s3 = scalar_lea.vmem %s20_s19, 4096  ;;  %p2631_p6 = scmp.lt.s32.totalorder %s20_s19, %s20_s19 }
  0x2d   :  { %p2627_p5 = scmp.ne.s32.totalorder %s20_s19, %s2626_s3  ;;  %p2632_p7 = scmp.lt.s32.totalorder %s2626_s3, %s2626_s3 }
  0x2f   :  { %p2633_p8 = por %p2632_p7, %p2631_p6 }
  0x31   :  { %p2634_p9 = pnand %p2633_p8, %p2627_p5 }
  0x33   :  { %2637 = shalt.err (!%p2634_p9)
}
  0x34   :  { %25 = dma.hbm_to_vmem [thread:$0]  %s2917_s0, 4096, %s20_s19, [#allocation3], %s2714_s30, %s2714_s30, %s2715_s6  }
  0x35   :  { %s2638_s10 = scalar_lea.hbm %s2919_s2, 4096 }
  0x36   :  { %p2639_p10 = scmp.ne.s32.totalorder %s2919_s2, %s2638_s10  ;;  %p2642_p11 = scmp.lt.u32.totalorder %s2638_s10, %s2919_s2 }
  0x38   :  { %p2644_p12 = pnand %p2642_p11, %p2639_p10 }
  0x3a   :  { %2647 = shalt.err (!%p2644_p12)
}
  0x3b   :  { %s2648_s15 = scalar_lea.vmem %s2787_s22, 4096  ;;  %p2653_p0 = scmp.lt.s32.totalorder %s2787_s22, %s2787_s22 }
  0x3c   :  { %p2649_p13 = scmp.ne.s32.totalorder %s2787_s22, %s2648_s15  ;;  %p2654_p1 = scmp.lt.s32.totalorder %s2648_s15, %s2648_s15 }
  0x3e   :  { %p2655_p2 = por %p2654_p1, %p2653_p0 }
  0x40   :  { %p2656_p3 = pnand %p2655_p2, %p2649_p13 }
  0x42   :  { %2659 = shalt.err (!%p2656_p3)
}
  0x43   :  { %49 = dma.hbm_to_vmem [thread:$0]  %s2919_s2, 4096, %s2787_s22, [#allocation6], %s2714_s30, %s2714_s30, %s2715_s6  }
  0x44   :  { %s2718_s1 = smov [#allocation10]   ;;  %s2660_s20 = scalar_lea.hbm %s2921_s4, 16 }
  0x45   :  { %s68_s17 = sshll.u32 %s2718_s1, 4  ;;  %p2661_p4 = scmp.ne.s32.totalorder %s2921_s4, %s2660_s20  ;;  %s69_s17 = int_to_ptr.vmem [resolvable:$true] %s68_s17 }
  0x46   :  { %p2664_p5 = scmp.lt.u32.totalorder %s2660_s20, %s2921_s4 }
  0x48   :  { %p2666_p6 = pnand %p2664_p5, %p2661_p4 }
  0x4a   :  { %2669 = shalt.err (!%p2666_p6)
}
  0x4b   :  { %s2670_s27 = scalar_lea.vmem %s69_s17, 16  ;;  %s2674_s2 = scalar_lea.vmem %s69_s17, 32 }
  0x4c   :  { %p2671_p7 = scmp.ne.s32.totalorder %s69_s17, %s2670_s27  ;;  %p2675_p8 = scmp.lt.s32.totalorder %s69_s17, %s69_s17 }
  0x4d   :  { %p2676_p9 = scmp.lt.s32.totalorder %s2674_s2, %s2670_s27 }
  0x4f   :  { %p2677_p10 = por %p2676_p9, %p2675_p8 }
  0x51   :  { %p2678_p11 = pnand %p2677_p10, %p2671_p7 }
  0x53   :  { %2681 = shalt.err (!%p2678_p11)
}
  0x54   :  { %71 = dma.hbm_to_vmem [thread:$0]  %s2921_s4, 16, %s69_s17, [#allocation9]  }
  0x55   :  { %2704 = dma.done.wait [#allocation3], 4096  }
  0x56   :  { %2705 = vsyncadd [#allocation3], 4294963200 }
  0x57   :  { %2706 = dma.done.wait [#allocation6], 5120  }
  0x58   :  { %2707 = vsyncadd [#allocation6], 4294962176 }
  0x59   :  { %2708 = dma.done.wait [#allocation9], 1040  }
  0x5a   :  { %2709 = vsyncadd [#allocation9], 4294966256  ;;  %v2492_v0 = vld [vmem:[#allocation8] sm:$0xff]   ;;  %v2494_v2 = vld [vmem:[#allocation8 + $0x8] sm:$0xff]   ;;  %s2719_s4 = smov [#allocation11]  }
  0x5b   :  { %v2493_v1 = vld [vmem:[#allocation5] sm:$0xff]   ;;  %2260 = vmatprep.subr.bf16.mxu1 %v2492_v0  ;;  %v2495_v3 = vld [vmem:[#allocation5 + $0x8] sm:$0xff]   ;;  %v2496_v4 = vld [vmem:[#allocation8 + $0x10] sm:$0xff]   ;;  %s1766_s29 = sshll.u32 %s2719_s4, 4  ;;  %s1767_s29 = int_to_ptr.vmem [resolvable:$true] %s1766_s29 }
  0x5c   :  { %2340 = vmatprep.subr.bf16.mxu0 %v2493_v1  ;;  %2261 = vmatpush3.bf16.msra.mxu1 %v2492_v0  ;;  %v2497_v5 = vld [vmem:[#allocation5 + $0x10] sm:$0xff]   ;;  %v2498_v6 = vld [vmem:[#allocation8 + $0x18] sm:$0xff]   ;;  %v2500_v8 = vld [vmem:[#allocation8 + $0x20] sm:$0xff]   ;;  %s2682_s3 = scalar_lea.vmem %s1767_s29, 4096  ;;  %p2687_p13 = scmp.lt.s32.totalorder %s1767_s29, %s1767_s29 }
  0x5d   :  { %2341 = vmatpush3.bf16.msra.mxu0 %v2493_v1  ;;  %2262 = vmatprep.subr.bf16.mxu1 %v2494_v2  ;;  %v2499_v7 = vld [vmem:[#allocation5 + $0x18] sm:$0xff]   ;;  %v2501_v9 = vld [vmem:[#allocation5 + $0x20] sm:$0xff]   ;;  %v2502_v10 = vld [vmem:[#allocation8 + $0x28] sm:$0xff]   ;;  %p2683_p12 = scmp.ne.s32.totalorder %s1767_s29, %s2682_s3  ;;  %p2688_p0 = scmp.lt.s32.totalorder %s2682_s3, %s2682_s3 }
  0x5e   :  { %2342 = vmatprep.subr.bf16.mxu0 %v2495_v3  ;;  %v2503_v11 = vld [vmem:[#allocation5 + $0x28] sm:$0xff]   ;;  %v2508_v12 = vld [vmem:[#allocation7] sm:$0xff]   ;;  %v2504_v14 = vld [vmem:[#allocation8 + $0x30] sm:$0xff]  }
  0x5f   :  { %v2509_v13 = vld [vmem:[#allocation2] sm:$0xff]   ;;  %2276 = vmatprep.mubr.bf16.mxu1 %v2508_v12  ;;  %v2505_v15 = vld [vmem:[#allocation5 + $0x30] sm:$0xff]   ;;  %v2506_v16 = vld [vmem:[#allocation8 + $0x38] sm:$0xff]   ;;  %p2689_p1 = por %p2688_p0, %p2687_p13 }
  0x60   :  { %2263 = vmatpush3.bf16.msra.mxu1 %v2494_v2  ;;  %2356 = vmatprep.mubr.bf16.mxu0 %v2509_v13  ;;  %v2507_v17 = vld [vmem:[#allocation5 + $0x38] sm:$0xff]   ;;  %v2510_v18 = vld [vmem:[#allocation7 + $0x8] sm:$0xff]   ;;  %v2512_v20 = vld [vmem:[#allocation7 + $0x10] sm:$0xff]  }
  0x61   :  { %2343 = vmatpush3.bf16.msra.mxu0 %v2495_v3  ;;  %2264 = vmatprep.subr.bf16.mxu1 %v2496_v4  ;;  %v2511_v19 = vld [vmem:[#allocation2 + $0x8] sm:$0xff]   ;;  %v2513_v21 = vld [vmem:[#allocation2 + $0x10] sm:$0xff]   ;;  %v2514_v22 = vld [vmem:[#allocation7 + $0x18] sm:$0xff]   ;;  %p2690_p2 = pnand %p2689_p1, %p2683_p12 }
  0x62   :  { %2344 = vmatprep.subr.bf16.mxu0 %v2497_v5  ;;  %v2515_v23 = vld [vmem:[#allocation2 + $0x18] sm:$0xff]   ;;  %v2516_v24 = vld [vmem:[#allocation7 + $0x20] sm:$0xff]   ;;  %v2518_v26 = vld [vmem:[#allocation7 + $0x28] sm:$0xff]  }
  0x63   :  { %v2517_v25 = vld [vmem:[#allocation2 + $0x20] sm:$0xff]   ;;  %v2519_v27 = vld [vmem:[#allocation2 + $0x28] sm:$0xff]   ;;  %v2520_v28 = vld [vmem:[#allocation7 + $0x30] sm:$0xff]  }
  0x64   :  { %2265 = vmatpush3.bf16.msra.mxu1 %v2496_v4  ;;  %v2521_v29 = vld [vmem:[#allocation2 + $0x30] sm:$0xff]   ;;  %v2522_v30 = vld [vmem:[#allocation7 + $0x38] sm:$0xff]   ;;  %v2524_v32 = vld [vmem:[#allocation7 + $0x40] sm:$0xff]  }
  0x65   :  { %2345 = vmatpush3.bf16.msra.mxu0 %v2497_v5  ;;  %2266 = vmatprep.subr.bf16.mxu1 %v2498_v6  ;;  %v2523_v31 = vld [vmem:[#allocation2 + $0x38] sm:$0xff]   ;;  %v2525_v33 = vld [vmem:[#allocation2 + $0x40] sm:$0xff]   ;;  %v2526_v34 = vld [vmem:[#allocation7 + $0x48] sm:$0xff]  }
  0x66   :  { %2346 = vmatprep.subr.bf16.mxu0 %v2499_v7  ;;  %v2527_v35 = vld [vmem:[#allocation2 + $0x48] sm:$0xff]   ;;  %v2528_v36 = vld [vmem:[#allocation7 + $0x50] sm:$0xff]   ;;  %v2530_v38 = vld [vmem:[#allocation7 + $0x58] sm:$0xff]  }
  0x67   :  { %v2529_v37 = vld [vmem:[#allocation2 + $0x50] sm:$0xff]   ;;  %v2531_v39 = vld [vmem:[#allocation2 + $0x58] sm:$0xff]   ;;  %v2532_v40 = vld [vmem:[#allocation7 + $0x60] sm:$0xff]  }
  0x68   :  { %2267 = vmatpush3.bf16.msra.mxu1 %v2498_v6  ;;  %v2533_v41 = vld [vmem:[#allocation2 + $0x60] sm:$0xff]   ;;  %v2534_v42 = vld [vmem:[#allocation7 + $0x68] sm:$0xff]   ;;  %v2536_v44 = vld [vmem:[#allocation7 + $0x70] sm:$0xff]  }
  0x69   :  { %2347 = vmatpush3.bf16.msra.mxu0 %v2499_v7  ;;  %2268 = vmatprep.subr.bf16.mxu1 %v2500_v8  ;;  %v2535_v43 = vld [vmem:[#allocation2 + $0x68] sm:$0xff]   ;;  %v2537_v45 = vld [vmem:[#allocation2 + $0x70] sm:$0xff]   ;;  %v2538_v46 = vld [vmem:[#allocation7 + $0x78] sm:$0xff]  }
  0x6a   :  { %2348 = vmatprep.subr.bf16.mxu0 %v2501_v9  ;;  %v2539_v47 = vld [vmem:[#allocation2 + $0x78] sm:$0xff]   ;;  %v2540_v48 = vld [vmem:[#allocation7 + $0x80] sm:$0xff]   ;;  %v2542_v50 = vld [vmem:[#allocation7 + $0x88] sm:$0xff]  }
  0x6b   :  { %v2541_v49 = vld [vmem:[#allocation2 + $0x80] sm:$0xff]   ;;  %v2543_v51 = vld [vmem:[#allocation2 + $0x88] sm:$0xff]   ;;  %v2544_v52 = vld [vmem:[#allocation7 + $0x90] sm:$0xff]  }
  0x6c   :  { %2269 = vmatpush3.bf16.msra.mxu1 %v2500_v8  ;;  %v2545_v53 = vld [vmem:[#allocation2 + $0x90] sm:$0xff]   ;;  %v2546_v54 = vld [vmem:[#allocation7 + $0x98] sm:$0xff]   ;;  %v2548_v56 = vld [vmem:[#allocation7 + $0xa0] sm:$0xff]  }
  0x6d   :  { %2349 = vmatpush3.bf16.msra.mxu0 %v2501_v9  ;;  %2270 = vmatprep.subr.bf16.mxu1 %v2502_v10  ;;  %v2547_v55 = vld [vmem:[#allocation2 + $0x98] sm:$0xff]   ;;  %v2549_v57 = vld [vmem:[#allocation2 + $0xa0] sm:$0xff]   ;;  %v2550_v58 = vld [vmem:[#allocation7 + $0xa8] sm:$0xff]  }
  0x6e   :  { %2350 = vmatprep.subr.bf16.mxu0 %v2503_v11  ;;  %v2551_v59 = vld [vmem:[#allocation2 + $0xa8] sm:$0xff]   ;;  %v2552_v60 = vld [vmem:[#allocation7 + $0xb0] sm:$0xff]   ;;  %v2554_v62 = vld [vmem:[#allocation7 + $0xb8] sm:$0xff]  }
  0x6f   :  { %v2553_v61 = vld [vmem:[#allocation2 + $0xb0] sm:$0xff]   ;;  %v2555_v63 = vld [vmem:[#allocation2 + $0xb8] sm:$0xff]   ;;  %v2556_v0 = vld [vmem:[#allocation7 + $0xc0] sm:$0xff]  }
  0x70   :  { %2271 = vmatpush3.bf16.msra.mxu1 %v2502_v10  ;;  %v2557_v1 = vld [vmem:[#allocation2 + $0xc0] sm:$0xff]   ;;  %v2558_v2 = vld [vmem:[#allocation7 + $0xc8] sm:$0xff]   ;;  %v2560_v4 = vld [vmem:[#allocation7 + $0xd0] sm:$0xff]  }
  0x71   :  { %2351 = vmatpush3.bf16.msra.mxu0 %v2503_v11  ;;  %2272 = vmatprep.subr.bf16.mxu1 %v2504_v14  ;;  %v2559_v3 = vld [vmem:[#allocation2 + $0xc8] sm:$0xff]   ;;  %v2561_v5 = vld [vmem:[#allocation2 + $0xd0] sm:$0xff]   ;;  %v2562_v6 = vld [vmem:[#allocation7 + $0xd8] sm:$0xff]  }
  0x72   :  { %2352 = vmatprep.subr.bf16.mxu0 %v2505_v15  ;;  %v2563_v7 = vld [vmem:[#allocation2 + $0xd8] sm:$0xff]   ;;  %v2564_v8 = vld [vmem:[#allocation7 + $0xe0] sm:$0xff]   ;;  %v2566_v10 = vld [vmem:[#allocation7 + $0xe8] sm:$0xff]  }
  0x73   :  { %v2565_v9 = vld [vmem:[#allocation2 + $0xe0] sm:$0xff]   ;;  %v2567_v11 = vld [vmem:[#allocation2 + $0xe8] sm:$0xff]   ;;  %v2568_v12 = vld [vmem:[#allocation7 + $0xf0] sm:$0xff]  }
  0x74   :  { %2273 = vmatpush3.bf16.msra.mxu1 %v2504_v14  ;;  %v2569_v13 = vld [vmem:[#allocation2 + $0xf0] sm:$0xff]   ;;  %v2570_v14 = vld [vmem:[#allocation7 + $0xf8] sm:$0xff]  }
  0x75   :  { %2353 = vmatpush3.bf16.msra.mxu0 %v2505_v15  ;;  %2274 = vmatprep.subr.bf16.mxu1 %v2506_v16  ;;  %v2571_v15 = vld [vmem:[#allocation2 + $0xf8] sm:$0xff]  }
  0x76   :  { %2354 = vmatprep.subr.bf16.mxu0 %v2507_v17 }
  0x78   :  { %2275 = vmatpush3.bf16.msra.mxu1 %v2506_v16 }
  0x79   :  { %2355 = vmatpush3.bf16.msra.mxu0 %v2507_v17 }
  0x7b   :  { %2277 = vmatmul.mubr.bf16.vlgmr.msra.gmra.mrb[0].mxu1 %v2510_v18  ;;  %v2836_v18 = vld [vmem:[#allocation10] ss:$0 sm:$0xff] }
  0x7c   :  { %2357 = vmatmul.mubr.bf16.vlgmr.msra.gmra.mrb[0].mxu0 %v2511_v19  ;;  %2280 = vmatprep.mubr.bf16.mxu1 %v2512_v20 }
  0x7d   :  { %2360 = vmatprep.mubr.bf16.mxu0 %v2513_v21 }
  0x83   :  { %2281 = vmatmul.mubr.bf16.gmra.mrb[4].mxu1 %v2514_v22 }
  0x84   :  { %2361 = vmatmul.mubr.bf16.gmra.mrb[4].mxu0 %v2515_v23  ;;  %2284 = vmatprep.mubr.bf16.mxu1 %v2516_v24 }
  0x85   :  { %2364 = vmatprep.mubr.bf16.mxu0 %v2517_v25 }
  0x8b   :  { %2285 = vmatmul.mubr.bf16.gmra.mrb[8].mxu1 %v2518_v26 }
  0x8c   :  { %2365 = vmatmul.mubr.bf16.gmra.mrb[8].mxu0 %v2519_v27  ;;  %2288 = vmatprep.mubr.bf16.mxu1 %v2520_v28 }
  0x8d   :  { %2368 = vmatprep.mubr.bf16.mxu0 %v2521_v29 }
  0x93   :  { %2289 = vmatmul.mubr.bf16.gmra.mrb[12].mxu1 %v2522_v30 }
  0x94   :  { %2369 = vmatmul.mubr.bf16.gmra.mrb[12].mxu0 %v2523_v31  ;;  %2292 = vmatprep.mubr.bf16.mxu1 %v2524_v32 }
  0x95   :  { %2372 = vmatprep.mubr.bf16.mxu0 %v2525_v33 }
  0x9b   :  { %2293 = vmatmul.mubr.bf16.gmra.mrb[16].mxu1 %v2526_v34 }
  0x9c   :  { %2373 = vmatmul.mubr.bf16.gmra.mrb[16].mxu0 %v2527_v35  ;;  %2296 = vmatprep.mubr.bf16.mxu1 %v2528_v36 }
  0x9d   :  { %2376 = vmatprep.mubr.bf16.mxu0 %v2529_v37 }
  0xa3   :  { %2297 = vmatmul.mubr.bf16.gmra.mrb[20].mxu1 %v2530_v38 }
  0xa4   :  { %2377 = vmatmul.mubr.bf16.gmra.mrb[20].mxu0 %v2531_v39  ;;  %2300 = vmatprep.mubr.bf16.mxu1 %v2532_v40 }
  0xa5   :  { %2380 = vmatprep.mubr.bf16.mxu0 %v2533_v41 }
  0xab   :  { %2301 = vmatmul.mubr.bf16.gmra.mrb[24].mxu1 %v2534_v42 }
  0xac   :  { %2381 = vmatmul.mubr.bf16.gmra.mrb[24].mxu0 %v2535_v43  ;;  %2304 = vmatprep.mubr.bf16.mxu1 %v2536_v44 }
  0xad   :  { %2384 = vmatprep.mubr.bf16.mxu0 %v2537_v45 }
  0xb3   :  { %2305 = vmatmul.mubr.bf16.gmra.mrb[28].mxu1 %v2538_v46 }
  0xb4   :  { %2385 = vmatmul.mubr.bf16.gmra.mrb[28].mxu0 %v2539_v47  ;;  %2308 = vmatprep.mubr.bf16.mxu1 %v2540_v48 }
  0xb5   :  { %2388 = vmatprep.mubr.bf16.mxu0 %v2541_v49 }
  0xbb   :  { %2309 = vmatmul.mubr.bf16.gmra.mrb[32].mxu1 %v2542_v50 }
  0xbc   :  { %2389 = vmatmul.mubr.bf16.gmra.mrb[32].mxu0 %v2543_v51  ;;  %2312 = vmatprep.mubr.bf16.mxu1 %v2544_v52 }
  0xbd   :  { %2392 = vmatprep.mubr.bf16.mxu0 %v2545_v53 }
  0xc3   :  { %2313 = vmatmul.mubr.bf16.gmra.mrb[36].mxu1 %v2546_v54 }
  0xc4   :  { %2393 = vmatmul.mubr.bf16.gmra.mrb[36].mxu0 %v2547_v55  ;;  %2316 = vmatprep.mubr.bf16.mxu1 %v2548_v56 }
  0xc5   :  { %2396 = vmatprep.mubr.bf16.mxu0 %v2549_v57 }
  0xcb   :  { %2317 = vmatmul.mubr.bf16.gmra.mrb[40].mxu1 %v2550_v58 }
  0xcc   :  { %2397 = vmatmul.mubr.bf16.gmra.mrb[40].mxu0 %v2551_v59  ;;  %2320 = vmatprep.mubr.bf16.mxu1 %v2552_v60 }
  0xcd   :  { %2400 = vmatprep.mubr.bf16.mxu0 %v2553_v61 }
  0xd3   :  { %2321 = vmatmul.mubr.bf16.gmra.mrb[44].mxu1 %v2554_v62 }
  0xd4   :  { %2401 = vmatmul.mubr.bf16.gmra.mrb[44].mxu0 %v2555_v63  ;;  %2324 = vmatprep.mubr.bf16.mxu1 %v2556_v0 }
  0xd5   :  { %2404 = vmatprep.mubr.bf16.mxu0 %v2557_v1 }
  0xdb   :  { %2325 = vmatmul.mubr.bf16.gmra.mrb[48].mxu1 %v2558_v2 }
  0xdc   :  { %2405 = vmatmul.mubr.bf16.gmra.mrb[48].mxu0 %v2559_v3  ;;  %2328 = vmatprep.mubr.bf16.mxu1 %v2560_v4 }
  0xdd   :  { %2408 = vmatprep.mubr.bf16.mxu0 %v2561_v5 }
  0xe3   :  { %2329 = vmatmul.mubr.bf16.gmra.mrb[52].mxu1 %v2562_v6 }
  0xe4   :  { %2409 = vmatmul.mubr.bf16.gmra.mrb[52].mxu0 %v2563_v7  ;;  %2332 = vmatprep.mubr.bf16.mxu1 %v2564_v8 }
  0xe5   :  { %2412 = vmatprep.mubr.bf16.mxu0 %v2565_v9 }
  0xeb   :  { %2333 = vmatmul.mubr.bf16.gmra.mrb[56].mxu1 %v2566_v10 }
  0xec   :  { %2413 = vmatmul.mubr.bf16.gmra.mrb[56].mxu0 %v2567_v11  ;;  %2336 = vmatprep.mubr.bf16.mxu1 %v2568_v12 }
  0xed   :  { %2416 = vmatprep.mubr.bf16.mxu0 %v2569_v13 }
  0xf3   :  { %2337 = vmatmul.mubr.bf16.gmra.mrb[60].mxu1 %v2570_v14 }
  0xf4   :  { %2417 = vmatmul.mubr.bf16.gmra.mrb[60].mxu0 %v2571_v15 }
 0x14e   :  { %v2278_v16 = vpop.f32.mrb[0].mxu1 }
 0x14f   :  { %v2358_v17 = vpop.f32.mrb[0].mxu0  ;;  %v522_v19 = vpop.f32.mrb[1].mxu1 }
 0x150   :  { %v1060_v20 = vadd.f32 %v2358_v17, %v2278_v16  ;;  %v1051_v21 = vpop.f32.mrb[1].mxu0  ;;  %v2279_v22 = vpop.f32.mrb[2].mxu1 }
 0x151   :  { %v1052_v23 = vadd.f32 %v1051_v21, %v522_v19  ;;  %v2359_v24 = vpop.f32.mrb[2].mxu0  ;;  %v525_v25 = vpop.f32.mrb[3].mxu1 }
 0x152   :  { %v1315_v26 = vadd.f32 %v2836_v18, %v1060_v20  ;;  %v1063_v27 = vadd.f32 %v2359_v24, %v2279_v22  ;;  %v1054_v28 = vpop.f32.mrb[3].mxu0 }
 0x153   :  { %v1313_v29 = vadd.f32 %v2836_v18, %v1052_v23  ;;  %v1055_v30 = vadd.f32 %v1054_v28, %v525_v25 }
 0x154   :  { %v1316_v31 = vadd.f32 %v2836_v18, %v1063_v27  ;;  %v1379_v33 = vmax.f32 %v1315_v26, 0.0 }
 0x155   :  { %v1314_v32 = vadd.f32 %v2836_v18, %v1055_v30  ;;  %v1377_v36 = vmax.f32 %v1313_v29, 0.0 }
 0x156   :  { %v1380_v34 = vmax.f32 %v1316_v31, 0.0  ;;  %v2282_v35 = vpop.f32.mrb[4].mxu1 }
 0x157   :  { %v1378_v37 = vmax.f32 %v1314_v32, 0.0  ;;  %v2362_v38 = vpop.f32.mrb[4].mxu0  ;;  %v538_v39 = vpop.f32.mrb[5].mxu1 }
 0x158   :  { %v1997_v40 = vpack.c.bf16 %v1380_v34, %v1379_v33  ;;  %v1076_v41 = vadd.f32 %v2362_v38, %v2282_v35  ;;  %v1067_v42 = vpop.f32.mrb[5].mxu0  ;;  %v2283_v43 = vpop.f32.mrb[6].mxu1 }
 0x159   :  { %v1992_v44 = vpack.c.bf16 %v1378_v37, %v1377_v36  ;;  %v1068_v45 = vadd.f32 %v1067_v42, %v538_v39  ;;  %v2363_v46 = vpop.f32.mrb[6].mxu0  ;;  %v541_v47 = vpop.f32.mrb[7].mxu1 }
 0x15a   :  { %2149 = vst [vmem:[#allocation11 + $0x8] sm:$0xff] %v1997_v40   ;;  %v1319_v48 = vadd.f32 %v2836_v18, %v1076_v41  ;;  %v1079_v49 = vadd.f32 %v2363_v46, %v2283_v43  ;;  %v1070_v50 = vpop.f32.mrb[7].mxu0 }
 0x15b   :  { %1993 = vst [vmem:[#allocation11] sm:$0xff] %v1992_v44   ;;  %v1317_v51 = vadd.f32 %v2836_v18, %v1068_v45  ;;  %v1071_v52 = vadd.f32 %v1070_v50, %v541_v47 }
 0x15c   :  { %v1320_v53 = vadd.f32 %v2836_v18, %v1079_v49  ;;  %v1383_v55 = vmax.f32 %v1319_v48, 0.0 }
 0x15d   :  { %v1318_v54 = vadd.f32 %v2836_v18, %v1071_v52  ;;  %v1381_v58 = vmax.f32 %v1317_v51, 0.0 }
 0x15e   :  { %v1384_v56 = vmax.f32 %v1320_v53, 0.0  ;;  %v2286_v57 = vpop.f32.mrb[8].mxu1 }
 0x15f   :  { %v1382_v59 = vmax.f32 %v1318_v54, 0.0  ;;  %v2366_v60 = vpop.f32.mrb[8].mxu0  ;;  %v554_v61 = vpop.f32.mrb[9].mxu1 }
 0x160   :  { %v2007_v62 = vpack.c.bf16 %v1384_v56, %v1383_v55  ;;  %v1092_v63 = vadd.f32 %v2366_v60, %v2286_v57  ;;  %v1083_v0 = vpop.f32.mrb[9].mxu0  ;;  %v2287_v1 = vpop.f32.mrb[10].mxu1 }
 0x161   :  { %v2002_v2 = vpack.c.bf16 %v1382_v59, %v1381_v58  ;;  %v1084_v3 = vadd.f32 %v1083_v0, %v554_v61  ;;  %v2367_v4 = vpop.f32.mrb[10].mxu0  ;;  %v557_v5 = vpop.f32.mrb[11].mxu1 }
 0x162   :  { %2151 = vst [vmem:[#allocation11 + $0x18] sm:$0xff] %v2007_v62   ;;  %v1323_v6 = vadd.f32 %v2836_v18, %v1092_v63  ;;  %v1095_v7 = vadd.f32 %v2367_v4, %v2287_v1  ;;  %v1086_v8 = vpop.f32.mrb[11].mxu0 }
 0x163   :  { %2150 = vst [vmem:[#allocation11 + $0x10] sm:$0xff] %v2002_v2   ;;  %v1321_v9 = vadd.f32 %v2836_v18, %v1084_v3  ;;  %v1087_v10 = vadd.f32 %v1086_v8, %v557_v5 }
 0x164   :  { %v1324_v11 = vadd.f32 %v2836_v18, %v1095_v7  ;;  %v1387_v13 = vmax.f32 %v1323_v6, 0.0 }
 0x165   :  { %v1322_v12 = vadd.f32 %v2836_v18, %v1087_v10  ;;  %v1385_v16 = vmax.f32 %v1321_v9, 0.0 }
 0x166   :  { %v1388_v14 = vmax.f32 %v1324_v11, 0.0  ;;  %v2290_v15 = vpop.f32.mrb[12].mxu1 }
 0x167   :  { %v1386_v17 = vmax.f32 %v1322_v12, 0.0  ;;  %v2370_v19 = vpop.f32.mrb[12].mxu0  ;;  %v570_v20 = vpop.f32.mrb[13].mxu1 }
 0x168   :  { %v2017_v21 = vpack.c.bf16 %v1388_v14, %v1387_v13  ;;  %v1108_v22 = vadd.f32 %v2370_v19, %v2290_v15  ;;  %v1099_v23 = vpop.f32.mrb[13].mxu0  ;;  %v2291_v24 = vpop.f32.mrb[14].mxu1 }
 0x169   :  { %v2012_v25 = vpack.c.bf16 %v1386_v17, %v1385_v16  ;;  %v1100_v26 = vadd.f32 %v1099_v23, %v570_v20  ;;  %v2371_v27 = vpop.f32.mrb[14].mxu0  ;;  %v573_v28 = vpop.f32.mrb[15].mxu1 }
 0x16a   :  { %2153 = vst [vmem:[#allocation11 + $0x28] sm:$0xff] %v2017_v21   ;;  %v1327_v29 = vadd.f32 %v2836_v18, %v1108_v22  ;;  %v1111_v30 = vadd.f32 %v2371_v27, %v2291_v24  ;;  %v1102_v31 = vpop.f32.mrb[15].mxu0 }
 0x16b   :  { %2152 = vst [vmem:[#allocation11 + $0x20] sm:$0xff] %v2012_v25   ;;  %v1325_v32 = vadd.f32 %v2836_v18, %v1100_v26  ;;  %v1103_v33 = vadd.f32 %v1102_v31, %v573_v28 }
 0x16c   :  { %v1328_v34 = vadd.f32 %v2836_v18, %v1111_v30  ;;  %v1391_v36 = vmax.f32 %v1327_v29, 0.0 }
 0x16d   :  { %v1326_v35 = vadd.f32 %v2836_v18, %v1103_v33  ;;  %v1389_v39 = vmax.f32 %v1325_v32, 0.0 }
 0x16e   :  { %v1392_v37 = vmax.f32 %v1328_v34, 0.0  ;;  %v2294_v38 = vpop.f32.mrb[16].mxu1 }
 0x16f   :  { %v1390_v40 = vmax.f32 %v1326_v35, 0.0  ;;  %v2374_v41 = vpop.f32.mrb[16].mxu0  ;;  %v586_v42 = vpop.f32.mrb[17].mxu1 }
 0x170   :  { %v2027_v43 = vpack.c.bf16 %v1392_v37, %v1391_v36  ;;  %v1124_v44 = vadd.f32 %v2374_v41, %v2294_v38  ;;  %v1115_v45 = vpop.f32.mrb[17].mxu0  ;;  %v2295_v46 = vpop.f32.mrb[18].mxu1 }
 0x171   :  { %v2022_v47 = vpack.c.bf16 %v1390_v40, %v1389_v39  ;;  %v1116_v48 = vadd.f32 %v1115_v45, %v586_v42  ;;  %v2375_v49 = vpop.f32.mrb[18].mxu0  ;;  %v589_v50 = vpop.f32.mrb[19].mxu1 }
 0x172   :  { %2155 = vst [vmem:[#allocation11 + $0x38] sm:$0xff] %v2027_v43   ;;  %v1331_v51 = vadd.f32 %v2836_v18, %v1124_v44  ;;  %v1127_v52 = vadd.f32 %v2375_v49, %v2295_v46  ;;  %v1118_v53 = vpop.f32.mrb[19].mxu0 }
 0x173   :  { %2154 = vst [vmem:[#allocation11 + $0x30] sm:$0xff] %v2022_v47   ;;  %v1329_v54 = vadd.f32 %v2836_v18, %v1116_v48  ;;  %v1119_v55 = vadd.f32 %v1118_v53, %v589_v50 }
 0x174   :  { %v1332_v56 = vadd.f32 %v2836_v18, %v1127_v52  ;;  %v1395_v58 = vmax.f32 %v1331_v51, 0.0 }
 0x175   :  { %v1330_v57 = vadd.f32 %v2836_v18, %v1119_v55  ;;  %v1393_v61 = vmax.f32 %v1329_v54, 0.0 }
 0x176   :  { %v1396_v59 = vmax.f32 %v1332_v56, 0.0  ;;  %v2298_v60 = vpop.f32.mrb[20].mxu1 }
 0x177   :  { %v1394_v62 = vmax.f32 %v1330_v57, 0.0  ;;  %v2378_v63 = vpop.f32.mrb[20].mxu0  ;;  %v602_v0 = vpop.f32.mrb[21].mxu1 }
 0x178   :  { %v2037_v1 = vpack.c.bf16 %v1396_v59, %v1395_v58  ;;  %v1140_v2 = vadd.f32 %v2378_v63, %v2298_v60  ;;  %v1131_v3 = vpop.f32.mrb[21].mxu0  ;;  %v2299_v4 = vpop.f32.mrb[22].mxu1 }
 0x179   :  { %v2032_v5 = vpack.c.bf16 %v1394_v62, %v1393_v61  ;;  %v1132_v6 = vadd.f32 %v1131_v3, %v602_v0  ;;  %v2379_v7 = vpop.f32.mrb[22].mxu0  ;;  %v605_v8 = vpop.f32.mrb[23].mxu1 }
 0x17a   :  { %2157 = vst [vmem:[#allocation11 + $0x48] sm:$0xff] %v2037_v1   ;;  %v1335_v9 = vadd.f32 %v2836_v18, %v1140_v2  ;;  %v1143_v10 = vadd.f32 %v2379_v7, %v2299_v4  ;;  %v1134_v11 = vpop.f32.mrb[23].mxu0 }
 0x17b   :  { %2156 = vst [vmem:[#allocation11 + $0x40] sm:$0xff] %v2032_v5   ;;  %v1333_v12 = vadd.f32 %v2836_v18, %v1132_v6  ;;  %v1135_v13 = vadd.f32 %v1134_v11, %v605_v8 }
 0x17c   :  { %v1336_v14 = vadd.f32 %v2836_v18, %v1143_v10  ;;  %v1399_v16 = vmax.f32 %v1335_v9, 0.0 }
 0x17d   :  { %v1334_v15 = vadd.f32 %v2836_v18, %v1135_v13  ;;  %v1397_v20 = vmax.f32 %v1333_v12, 0.0 }
 0x17e   :  { %v1400_v17 = vmax.f32 %v1336_v14, 0.0  ;;  %v2302_v19 = vpop.f32.mrb[24].mxu1 }
 0x17f   :  { %v1398_v21 = vmax.f32 %v1334_v15, 0.0  ;;  %v2382_v22 = vpop.f32.mrb[24].mxu0  ;;  %v618_v23 = vpop.f32.mrb[25].mxu1 }
 0x180   :  { %v2047_v24 = vpack.c.bf16 %v1400_v17, %v1399_v16  ;;  %v1156_v25 = vadd.f32 %v2382_v22, %v2302_v19  ;;  %v1147_v26 = vpop.f32.mrb[25].mxu0  ;;  %v2303_v27 = vpop.f32.mrb[26].mxu1 }
 0x181   :  { %v2042_v28 = vpack.c.bf16 %v1398_v21, %v1397_v20  ;;  %v1148_v29 = vadd.f32 %v1147_v26, %v618_v23  ;;  %v2383_v30 = vpop.f32.mrb[26].mxu0  ;;  %v621_v31 = vpop.f32.mrb[27].mxu1 }
 0x182   :  { %2159 = vst [vmem:[#allocation11 + $0x58] sm:$0xff] %v2047_v24   ;;  %v1339_v32 = vadd.f32 %v2836_v18, %v1156_v25  ;;  %v1159_v33 = vadd.f32 %v2383_v30, %v2303_v27  ;;  %v1150_v34 = vpop.f32.mrb[27].mxu0 }
 0x183   :  { %2158 = vst [vmem:[#allocation11 + $0x50] sm:$0xff] %v2042_v28   ;;  %v1337_v35 = vadd.f32 %v2836_v18, %v1148_v29  ;;  %v1151_v36 = vadd.f32 %v1150_v34, %v621_v31 }
 0x184   :  { %v1340_v37 = vadd.f32 %v2836_v18, %v1159_v33  ;;  %v1403_v39 = vmax.f32 %v1339_v32, 0.0 }
 0x185   :  { %v1338_v38 = vadd.f32 %v2836_v18, %v1151_v36  ;;  %v1401_v42 = vmax.f32 %v1337_v35, 0.0 }
 0x186   :  { %v1404_v40 = vmax.f32 %v1340_v37, 0.0  ;;  %v2306_v41 = vpop.f32.mrb[28].mxu1 }
 0x187   :  { %v1402_v43 = vmax.f32 %v1338_v38, 0.0  ;;  %v2386_v44 = vpop.f32.mrb[28].mxu0  ;;  %v634_v45 = vpop.f32.mrb[29].mxu1 }
 0x188   :  { %v2057_v46 = vpack.c.bf16 %v1404_v40, %v1403_v39  ;;  %v1172_v47 = vadd.f32 %v2386_v44, %v2306_v41  ;;  %v1163_v48 = vpop.f32.mrb[29].mxu0  ;;  %v2307_v49 = vpop.f32.mrb[30].mxu1 }
 0x189   :  { %v2052_v50 = vpack.c.bf16 %v1402_v43, %v1401_v42  ;;  %v1164_v51 = vadd.f32 %v1163_v48, %v634_v45  ;;  %v2387_v52 = vpop.f32.mrb[30].mxu0  ;;  %v637_v53 = vpop.f32.mrb[31].mxu1 }
 0x18a   :  { %2161 = vst [vmem:[#allocation11 + $0x68] sm:$0xff] %v2057_v46   ;;  %v1343_v54 = vadd.f32 %v2836_v18, %v1172_v47  ;;  %v1175_v55 = vadd.f32 %v2387_v52, %v2307_v49  ;;  %v1166_v56 = vpop.f32.mrb[31].mxu0 }
 0x18b   :  { %2160 = vst [vmem:[#allocation11 + $0x60] sm:$0xff] %v2052_v50   ;;  %v1341_v57 = vadd.f32 %v2836_v18, %v1164_v51  ;;  %v1167_v58 = vadd.f32 %v1166_v56, %v637_v53 }
 0x18c   :  { %v1344_v59 = vadd.f32 %v2836_v18, %v1175_v55  ;;  %v1407_v61 = vmax.f32 %v1343_v54, 0.0 }
 0x18d   :  { %v1342_v60 = vadd.f32 %v2836_v18, %v1167_v58  ;;  %v1405_v0 = vmax.f32 %v1341_v57, 0.0 }
 0x18e   :  { %v1408_v62 = vmax.f32 %v1344_v59, 0.0  ;;  %v2310_v63 = vpop.f32.mrb[32].mxu1 }
 0x18f   :  { %v1406_v1 = vmax.f32 %v1342_v60, 0.0  ;;  %v2390_v2 = vpop.f32.mrb[32].mxu0  ;;  %v650_v3 = vpop.f32.mrb[33].mxu1 }
 0x190   :  { %v2067_v4 = vpack.c.bf16 %v1408_v62, %v1407_v61  ;;  %v1188_v5 = vadd.f32 %v2390_v2, %v2310_v63  ;;  %v1179_v6 = vpop.f32.mrb[33].mxu0  ;;  %v2311_v7 = vpop.f32.mrb[34].mxu1 }
 0x191   :  { %v2062_v8 = vpack.c.bf16 %v1406_v1, %v1405_v0  ;;  %v1180_v9 = vadd.f32 %v1179_v6, %v650_v3  ;;  %v2391_v10 = vpop.f32.mrb[34].mxu0  ;;  %v653_v11 = vpop.f32.mrb[35].mxu1 }
 0x192   :  { %2163 = vst [vmem:[#allocation11 + $0x78] sm:$0xff] %v2067_v4   ;;  %v1347_v12 = vadd.f32 %v2836_v18, %v1188_v5  ;;  %v1191_v13 = vadd.f32 %v2391_v10, %v2311_v7  ;;  %v1182_v14 = vpop.f32.mrb[35].mxu0 }
 0x193   :  { %2162 = vst [vmem:[#allocation11 + $0x70] sm:$0xff] %v2062_v8   ;;  %v1345_v15 = vadd.f32 %v2836_v18, %v1180_v9  ;;  %v1183_v16 = vadd.f32 %v1182_v14, %v653_v11 }
 0x194   :  { %v1348_v17 = vadd.f32 %v2836_v18, %v1191_v13  ;;  %v1411_v20 = vmax.f32 %v1347_v12, 0.0 }
 0x195   :  { %v1346_v19 = vadd.f32 %v2836_v18, %v1183_v16  ;;  %v1409_v23 = vmax.f32 %v1345_v15, 0.0 }
 0x196   :  { %v1412_v21 = vmax.f32 %v1348_v17, 0.0  ;;  %v2314_v22 = vpop.f32.mrb[36].mxu1 }
 0x197   :  { %v1410_v24 = vmax.f32 %v1346_v19, 0.0  ;;  %v2394_v25 = vpop.f32.mrb[36].mxu0  ;;  %v666_v26 = vpop.f32.mrb[37].mxu1 }
 0x198   :  { %v2077_v27 = vpack.c.bf16 %v1412_v21, %v1411_v20  ;;  %v1204_v28 = vadd.f32 %v2394_v25, %v2314_v22  ;;  %v1195_v29 = vpop.f32.mrb[37].mxu0  ;;  %v2315_v30 = vpop.f32.mrb[38].mxu1 }
 0x199   :  { %v2072_v31 = vpack.c.bf16 %v1410_v24, %v1409_v23  ;;  %v1196_v32 = vadd.f32 %v1195_v29, %v666_v26  ;;  %v2395_v33 = vpop.f32.mrb[38].mxu0  ;;  %v669_v34 = vpop.f32.mrb[39].mxu1 }
 0x19a   :  { %2165 = vst [vmem:[#allocation11 + $0x88] sm:$0xff] %v2077_v27   ;;  %v1351_v35 = vadd.f32 %v2836_v18, %v1204_v28  ;;  %v1207_v36 = vadd.f32 %v2395_v33, %v2315_v30  ;;  %v1198_v37 = vpop.f32.mrb[39].mxu0 }
 0x19b   :  { %2164 = vst [vmem:[#allocation11 + $0x80] sm:$0xff] %v2072_v31   ;;  %v1349_v38 = vadd.f32 %v2836_v18, %v1196_v32  ;;  %v1199_v39 = vadd.f32 %v1198_v37, %v669_v34 }
 0x19c   :  { %v1352_v40 = vadd.f32 %v2836_v18, %v1207_v36  ;;  %v1415_v42 = vmax.f32 %v1351_v35, 0.0 }
 0x19d   :  { %v1350_v41 = vadd.f32 %v2836_v18, %v1199_v39  ;;  %v1413_v45 = vmax.f32 %v1349_v38, 0.0 }
 0x19e   :  { %v1416_v43 = vmax.f32 %v1352_v40, 0.0  ;;  %v2318_v44 = vpop.f32.mrb[40].mxu1 }
 0x19f   :  { %v1414_v46 = vmax.f32 %v1350_v41, 0.0  ;;  %v2398_v47 = vpop.f32.mrb[40].mxu0  ;;  %v682_v48 = vpop.f32.mrb[41].mxu1 }
 0x1a0   :  { %v2087_v49 = vpack.c.bf16 %v1416_v43, %v1415_v42  ;;  %v1220_v50 = vadd.f32 %v2398_v47, %v2318_v44  ;;  %v1211_v51 = vpop.f32.mrb[41].mxu0  ;;  %v2319_v52 = vpop.f32.mrb[42].mxu1 }
 0x1a1   :  { %v2082_v53 = vpack.c.bf16 %v1414_v46, %v1413_v45  ;;  %v1212_v54 = vadd.f32 %v1211_v51, %v682_v48  ;;  %v2399_v55 = vpop.f32.mrb[42].mxu0  ;;  %v685_v56 = vpop.f32.mrb[43].mxu1 }
 0x1a2   :  { %2167 = vst [vmem:[#allocation11 + $0x98] sm:$0xff] %v2087_v49   ;;  %v1355_v57 = vadd.f32 %v2836_v18, %v1220_v50  ;;  %v1223_v58 = vadd.f32 %v2399_v55, %v2319_v52  ;;  %v1214_v59 = vpop.f32.mrb[43].mxu0 }
 0x1a3   :  { %2166 = vst [vmem:[#allocation11 + $0x90] sm:$0xff] %v2082_v53   ;;  %v1353_v60 = vadd.f32 %v2836_v18, %v1212_v54  ;;  %v1215_v61 = vadd.f32 %v1214_v59, %v685_v56 }
 0x1a4   :  { %v1356_v62 = vadd.f32 %v2836_v18, %v1223_v58  ;;  %v1419_v0 = vmax.f32 %v1355_v57, 0.0 }
 0x1a5   :  { %v1354_v63 = vadd.f32 %v2836_v18, %v1215_v61  ;;  %v1417_v3 = vmax.f32 %v1353_v60, 0.0 }
 0x1a6   :  { %v1420_v1 = vmax.f32 %v1356_v62, 0.0  ;;  %v2322_v2 = vpop.f32.mrb[44].mxu1 }
 0x1a7   :  { %v1418_v4 = vmax.f32 %v1354_v63, 0.0  ;;  %v2402_v5 = vpop.f32.mrb[44].mxu0  ;;  %v698_v6 = vpop.f32.mrb[45].mxu1 }
 0x1a8   :  { %v2097_v7 = vpack.c.bf16 %v1420_v1, %v1419_v0  ;;  %v1236_v8 = vadd.f32 %v2402_v5, %v2322_v2  ;;  %v1227_v9 = vpop.f32.mrb[45].mxu0  ;;  %v2323_v10 = vpop.f32.mrb[46].mxu1 }
 0x1a9   :  { %v2092_v11 = vpack.c.bf16 %v1418_v4, %v1417_v3  ;;  %v1228_v12 = vadd.f32 %v1227_v9, %v698_v6  ;;  %v2403_v13 = vpop.f32.mrb[46].mxu0  ;;  %v701_v14 = vpop.f32.mrb[47].mxu1 }
 0x1aa   :  { %2169 = vst [vmem:[#allocation11 + $0xa8] sm:$0xff] %v2097_v7   ;;  %v1359_v15 = vadd.f32 %v2836_v18, %v1236_v8  ;;  %v1239_v16 = vadd.f32 %v2403_v13, %v2323_v10  ;;  %v1230_v17 = vpop.f32.mrb[47].mxu0 }
 0x1ab   :  { %2168 = vst [vmem:[#allocation11 + $0xa0] sm:$0xff] %v2092_v11   ;;  %v1357_v19 = vadd.f32 %v2836_v18, %v1228_v12  ;;  %v1231_v20 = vadd.f32 %v1230_v17, %v701_v14 }
 0x1ac   :  { %v1360_v21 = vadd.f32 %v2836_v18, %v1239_v16  ;;  %v1423_v23 = vmax.f32 %v1359_v15, 0.0 }
 0x1ad   :  { %v1358_v22 = vadd.f32 %v2836_v18, %v1231_v20  ;;  %v1421_v26 = vmax.f32 %v1357_v19, 0.0 }
 0x1ae   :  { %v1424_v24 = vmax.f32 %v1360_v21, 0.0  ;;  %v2326_v25 = vpop.f32.mrb[48].mxu1 }
 0x1af   :  { %v1422_v27 = vmax.f32 %v1358_v22, 0.0  ;;  %v2406_v28 = vpop.f32.mrb[48].mxu0  ;;  %v714_v29 = vpop.f32.mrb[49].mxu1 }
 0x1b0   :  { %v2107_v30 = vpack.c.bf16 %v1424_v24, %v1423_v23  ;;  %v1252_v31 = vadd.f32 %v2406_v28, %v2326_v25  ;;  %v1243_v32 = vpop.f32.mrb[49].mxu0  ;;  %v2327_v33 = vpop.f32.mrb[50].mxu1 }
 0x1b1   :  { %v2102_v34 = vpack.c.bf16 %v1422_v27, %v1421_v26  ;;  %v1244_v35 = vadd.f32 %v1243_v32, %v714_v29  ;;  %v2407_v36 = vpop.f32.mrb[50].mxu0  ;;  %v717_v37 = vpop.f32.mrb[51].mxu1 }
 0x1b2   :  { %2171 = vst [vmem:[#allocation11 + $0xb8] sm:$0xff] %v2107_v30   ;;  %v1363_v38 = vadd.f32 %v2836_v18, %v1252_v31  ;;  %v1255_v39 = vadd.f32 %v2407_v36, %v2327_v33  ;;  %v1246_v40 = vpop.f32.mrb[51].mxu0 }
 0x1b3   :  { %2170 = vst [vmem:[#allocation11 + $0xb0] sm:$0xff] %v2102_v34   ;;  %v1361_v41 = vadd.f32 %v2836_v18, %v1244_v35  ;;  %v1247_v42 = vadd.f32 %v1246_v40, %v717_v37 }
 0x1b4   :  { %v1364_v43 = vadd.f32 %v2836_v18, %v1255_v39  ;;  %v1427_v45 = vmax.f32 %v1363_v38, 0.0 }
 0x1b5   :  { %v1362_v44 = vadd.f32 %v2836_v18, %v1247_v42  ;;  %v1425_v48 = vmax.f32 %v1361_v41, 0.0 }
 0x1b6   :  { %v1428_v46 = vmax.f32 %v1364_v43, 0.0  ;;  %v2330_v47 = vpop.f32.mrb[52].mxu1 }
 0x1b7   :  { %v1426_v49 = vmax.f32 %v1362_v44, 0.0  ;;  %v2410_v50 = vpop.f32.mrb[52].mxu0  ;;  %v730_v51 = vpop.f32.mrb[53].mxu1 }
 0x1b8   :  { %v2117_v52 = vpack.c.bf16 %v1428_v46, %v1427_v45  ;;  %v1268_v53 = vadd.f32 %v2410_v50, %v2330_v47  ;;  %v1259_v54 = vpop.f32.mrb[53].mxu0  ;;  %v2331_v55 = vpop.f32.mrb[54].mxu1 }
 0x1b9   :  { %v2112_v56 = vpack.c.bf16 %v1426_v49, %v1425_v48  ;;  %v1260_v57 = vadd.f32 %v1259_v54, %v730_v51  ;;  %v2411_v58 = vpop.f32.mrb[54].mxu0  ;;  %v733_v59 = vpop.f32.mrb[55].mxu1 }
 0x1ba   :  { %2173 = vst [vmem:[#allocation11 + $0xc8] sm:$0xff] %v2117_v52   ;;  %v1367_v60 = vadd.f32 %v2836_v18, %v1268_v53  ;;  %v1271_v61 = vadd.f32 %v2411_v58, %v2331_v55  ;;  %v1262_v62 = vpop.f32.mrb[55].mxu0 }
 0x1bb   :  { %2172 = vst [vmem:[#allocation11 + $0xc0] sm:$0xff] %v2112_v56   ;;  %v1365_v63 = vadd.f32 %v2836_v18, %v1260_v57  ;;  %v1263_v0 = vadd.f32 %v1262_v62, %v733_v59 }
 0x1bc   :  { %v1368_v1 = vadd.f32 %v2836_v18, %v1271_v61  ;;  %v1431_v3 = vmax.f32 %v1367_v60, 0.0 }
 0x1bd   :  { %v1366_v2 = vadd.f32 %v2836_v18, %v1263_v0  ;;  %v1429_v6 = vmax.f32 %v1365_v63, 0.0 }
 0x1be   :  { %v1432_v4 = vmax.f32 %v1368_v1, 0.0  ;;  %v2334_v5 = vpop.f32.mrb[56].mxu1 }
 0x1bf   :  { %v1430_v7 = vmax.f32 %v1366_v2, 0.0  ;;  %v2414_v8 = vpop.f32.mrb[56].mxu0  ;;  %v746_v9 = vpop.f32.mrb[57].mxu1 }
 0x1c0   :  { %v2127_v10 = vpack.c.bf16 %v1432_v4, %v1431_v3  ;;  %v1284_v11 = vadd.f32 %v2414_v8, %v2334_v5  ;;  %v1275_v12 = vpop.f32.mrb[57].mxu0  ;;  %v2335_v13 = vpop.f32.mrb[58].mxu1 }
 0x1c1   :  { %v2122_v14 = vpack.c.bf16 %v1430_v7, %v1429_v6  ;;  %v1276_v15 = vadd.f32 %v1275_v12, %v746_v9  ;;  %v2415_v16 = vpop.f32.mrb[58].mxu0  ;;  %v749_v17 = vpop.f32.mrb[59].mxu1 }
 0x1c2   :  { %2175 = vst [vmem:[#allocation11 + $0xd8] sm:$0xff] %v2127_v10   ;;  %v1371_v19 = vadd.f32 %v2836_v18, %v1284_v11  ;;  %v1287_v20 = vadd.f32 %v2415_v16, %v2335_v13  ;;  %v1278_v21 = vpop.f32.mrb[59].mxu0 }
 0x1c3   :  { %2174 = vst [vmem:[#allocation11 + $0xd0] sm:$0xff] %v2122_v14   ;;  %v1369_v22 = vadd.f32 %v2836_v18, %v1276_v15  ;;  %v1279_v23 = vadd.f32 %v1278_v21, %v749_v17 }
 0x1c4   :  { %v1372_v24 = vadd.f32 %v2836_v18, %v1287_v20  ;;  %v1435_v26 = vmax.f32 %v1371_v19, 0.0 }
 0x1c5   :  { %v1370_v25 = vadd.f32 %v2836_v18, %v1279_v23  ;;  %v1433_v29 = vmax.f32 %v1369_v22, 0.0 }
 0x1c6   :  { %v1436_v27 = vmax.f32 %v1372_v24, 0.0  ;;  %v2338_v28 = vpop.f32.mrb[60].mxu1 }
 0x1c7   :  { %v1434_v30 = vmax.f32 %v1370_v25, 0.0  ;;  %v2418_v31 = vpop.f32.mrb[60].mxu0  ;;  %v762_v32 = vpop.f32.mrb[61].mxu1 }
 0x1c8   :  { %v2137_v33 = vpack.c.bf16 %v1436_v27, %v1435_v26  ;;  %v1300_v34 = vadd.f32 %v2418_v31, %v2338_v28  ;;  %v1291_v35 = vpop.f32.mrb[61].mxu0  ;;  %v2339_v36 = vpop.f32.mrb[62].mxu1 }
 0x1c9   :  { %v2132_v37 = vpack.c.bf16 %v1434_v30, %v1433_v29  ;;  %v1292_v38 = vadd.f32 %v1291_v35, %v762_v32  ;;  %v2419_v39 = vpop.f32.mrb[62].mxu0  ;;  %v765_v40 = vpop.f32.mrb[63].mxu1 }
 0x1ca   :  { %2177 = vst [vmem:[#allocation11 + $0xe8] sm:$0xff] %v2137_v33   ;;  %v1375_v41 = vadd.f32 %v2836_v18, %v1300_v34  ;;  %v1303_v42 = vadd.f32 %v2419_v39, %v2339_v36  ;;  %v1294_v43 = vpop.f32.mrb[63].mxu0 }
 0x1cb   :  { %2176 = vst [vmem:[#allocation11 + $0xe0] sm:$0xff] %v2132_v37   ;;  %v1373_v44 = vadd.f32 %v2836_v18, %v1292_v38  ;;  %v1295_v45 = vadd.f32 %v1294_v43, %v765_v40 }
 0x1cc   :  { %v1376_v46 = vadd.f32 %v2836_v18, %v1303_v42  ;;  %v1439_v48 = vmax.f32 %v1375_v41, 0.0 }
 0x1cd   :  { %v1374_v47 = vadd.f32 %v2836_v18, %v1295_v45  ;;  %v1437_v50 = vmax.f32 %v1373_v44, 0.0 }
 0x1ce   :  { %v1440_v49 = vmax.f32 %v1376_v46, 0.0 }
 0x1cf   :  { %v1438_v51 = vmax.f32 %v1374_v47, 0.0 }
 0x1d0   :  { %v2147_v52 = vpack.c.bf16 %v1440_v49, %v1439_v48 }
 0x1d1   :  { %v2142_v53 = vpack.c.bf16 %v1438_v51, %v1437_v50 }
 0x1d2   :  { %2179 = vst [vmem:[#allocation11 + $0xf8] sm:$0xff] %v2147_v52  }
 0x1d3   :  { %2178 = vst [vmem:[#allocation11 + $0xf0] sm:$0xff] %v2142_v53  }
 0x1d4   :  { %2693 = shalt.err (!%p2690_p2)
}
 0x1d5   :  { %s2694_s8 = scalar_lea.hbm %s2922_s5, 4096 }
 0x1d6   :  { %p2695_p3 = scmp.ne.s32.totalorder %s2922_s5, %s2694_s8  ;;  %p2698_p4 = scmp.lt.u32.totalorder %s2694_s8, %s2922_s5 }
 0x1d8   :  { %p2700_p5 = pnand %p2698_p4, %p2695_p3 }
 0x1da   :  { %2703 = shalt.err (!%p2700_p5)
}
 0x1db   :  { %1772 = dma.vmem_to_hbm [thread:$0]  %s1767_s29, 4096, %s2922_s5, [#allocation4], %s2714_s30, %s2714_s30, %s2715_s6  }
 0x1dc   :  { %2710 = dma.done.wait [#allocation4], 4096  }
 0x1dd   :  { %2711 = vsyncadd [#allocation4], 4294963200 }
 0x1de   :  { %1776 = vsyncpa [#allocation3], 1 }
 0x1df   :  { %1777 = vsyncpa [#allocation6], 1 }
 0x1e0   :  { %1778 = vsyncpa [#allocation9], 1 }
 0x1e1   :  { %1779 = vsyncpa [#allocation4], 1 }

</bundles_post_ra>
